<compile_context>
chip_gen: v7x
topology: tpu7x:2x2x1
jax: 0.10.0
libtpu: 0.0.40
codegen_flags: <defaults>
</compile_context>

<pallas_src>
import functools
import math

import jax
import jax.numpy as jnp
from jax import lax
from jax.experimental import pallas as pl
from jax.experimental.pallas import tpu as pltpu

# ----------------- small synthetic BERT config -----------------
HIDDEN = 32
N_HEADS = 2
HEAD_DIM = HIDDEN // N_HEADS
N_LAYERS = 2
INTERMEDIATE = 4 * HIDDEN          # 128
VOCAB = 100
MAX_POS = 16
TYPE_VOCAB = 2
LN_EPS = 1e-12

NUM_SENT = 3                       # num_classes_sentiment
NUM_LANG = 4                       # num_classes_language
ADV_HEADS = 3
ADV_DIM = ADV_HEADS * NUM_LANG     # 12

LANES = 128
VOCAB_PAD = 128                    # vocab fits in one lane tile (one-hot gather on the MXU)
assert VOCAB <= VOCAB_PAD

# ---- packed "misc" slab row offsets (f32, shape (MISC_ROWS, 128)) ----
MISC_WORD = 0                                  # rows   0:128  lanes 0:H   word embeddings (padded)
MISC_POS = VOCAB_PAD                           # rows 128:144  lanes 0:H   position embeddings
MISC_TYPE = MISC_POS + MAX_POS                 # row  144      lanes 0:H   token-type-0 embedding
MISC_ELN_G = MISC_TYPE + 1                     # row  145      emb LayerNorm gamma
MISC_ELN_B = MISC_ELN_G + 1                    # row  146      emb LayerNorm beta
MISC_POOL_W = 152                              # rows 152:184  lanes 0:H   pooler weight
MISC_POOL_B = MISC_POOL_W + HIDDEN             # row  184      pooler bias
MISC_HEAD1_W = 192                             # rows 192:224  lanes 0:15  [sentiment | adv1 | adv2 | adv3]
MISC_HEAD1_B = MISC_HEAD1_W + HIDDEN           # row  224
MISC_ADV2_W = 232                              # rows 232:244  lanes 0:12  block-diag adversarial stage-2
MISC_ADV2_B = MISC_ADV2_W + ADV_DIM            # row  244
MISC_ROWS = 248

# ---- packed per-layer matrix slab (bf16, shape (L, MAT_ROWS, 128)) ----
#   rows   0: 32  -> lanes 0:96  qkv_w (scale folded into Q cols)   lanes 96:128 attn-output W
#   rows  32: 64  -> lanes 0:128 ffn_w1
#   rows  64:192  -> lanes 0:32  ffn_w2
MAT_ROWS = 2 * HIDDEN + INTERMEDIATE           # 192

# ---- packed per-layer bias / LN slab (f32, shape (L, 8, 128)) ----
VEC_QKV_B, VEC_AO_B, VEC_LN1_G, VEC_LN1_B = 0, 1, 2, 3
VEC_FFN_B1, VEC_FFN_B2, VEC_LN2_G, VEC_LN2_B = 4, 5, 6, 7
VEC_ROWS = 8


# ----------------- fused forward kernel -----------------
def _fused_forward_kernel(ids_ref, mask_ref, mats_ref, vecs_ref, misc_ref,
                          sent_ref, adv_ref, *, B, S):
    H, I, NH, HD = HIDDEN, INTERMEDIATE, N_HEADS, HEAD_DIM

    def layernorm(x, g, b):
        mu = jnp.mean(x, axis=-1, keepdims=True)
        var = jnp.mean(jnp.square(x - mu), axis=-1, keepdims=True)
        return (x - mu) * lax.rsqrt(var + LN_EPS) * g + b

    def gelu(x):
        # tanh-approximation GELU: one EUP transcendental instead of ~10 VALU ops.
        c = 0.7978845608028654  # sqrt(2/pi)
        return 0.5 * x * (1.0 + jnp.tanh(c * (x + 0.044715 * x * x * x)))

    # ----- embeddings: one-hot gather on the MXU + pos/type add + LayerNorm -----
    ids = ids_ref[...]                                                   # (B*S, 1) int32
    onehot = (lax.broadcasted_iota(jnp.int32, (B * S, VOCAB_PAD), 1) == ids
              ).astype(jnp.float32)                                      # (B*S, 128)
    word = jnp.dot(onehot, misc_ref[MISC_WORD:MISC_WORD + VOCAB_PAD, 0:H],
                   preferred_element_type=jnp.float32)                   # (B*S, H)
    pos = misc_ref[MISC_POS:MISC_POS + S, 0:H]                           # (S, H)
    x = word + jnp.concatenate([pos] * B, axis=0) \
        + misc_ref[MISC_TYPE:MISC_TYPE + 1, 0:H]                         # token_type_ids == 0
    h = layernorm(x, misc_ref[MISC_ELN_G:MISC_ELN_G + 1, 0:H],
                  misc_ref[MISC_ELN_B:MISC_ELN_B + 1, 0:H])              # (B*S, H)

    # additive attention-mask bias, tiled over heads: (B,1,S) -> (B*NH,1,S)
    mbias = (1.0 - mask_ref[...]) * -10000.0                             # (B, 1, S)
    mbias = jnp.concatenate([mbias] * NH, axis=0)                        # (B*NH, 1, S)

    # ----- encoder layers (fully unrolled; N_LAYERS=2) -----
    for li in range(N_LAYERS):
        hb = h.astype(jnp.bfloat16)
        # fused QKV projection (scale already folded into the Q columns)
        qkv = jnp.dot(hb, mats_ref[li, 0:H, 0:3 * H],
                      preferred_element_type=jnp.float32)
        qkv = qkv + vecs_ref[li, VEC_QKV_B:VEC_QKV_B + 1, 0:3 * H]       # (B*S, 3H)
        qkv3 = qkv.reshape(B, S, 3 * H)

        # arrange as (B*NH, S, HD): batch index g = head*B + b
        q = jnp.concatenate([qkv3[:, :, hh * HD:(hh + 1) * HD]
                             for hh in range(NH)], axis=0)
        k = jnp.concatenate([qkv3[:, :, H + hh * HD:H + (hh + 1) * HD]
                             for hh in range(NH)], axis=0)
        v = jnp.concatenate([qkv3[:, :, 2 * H + hh * HD:2 * H + (hh + 1) * HD]
                             for hh in range(NH)], axis=0)

        # single batched QK^T, single softmax, single batched P*V
        s = jnp.einsum("gqd,gkd->gqk", q, k,
                       preferred_element_type=jnp.float32) + mbias       # (G, S, S)
        m = jnp.max(s, axis=-1, keepdims=True)
        p = jnp.exp(s - m)
        p = p / jnp.sum(p, axis=-1, keepdims=True)
        ctx = jnp.einsum("gqk,gkd->gqd", p, v,
                         preferred_element_type=jnp.float32)             # (G, S, HD)
        ctx = jnp.concatenate([ctx[hh * B:(hh + 1) * B]
                               for hh in range(NH)], axis=-1)            # (B, S, H)
        ctx = ctx.reshape(B * S, H)

        attn = jnp.dot(ctx.astype(jnp.bfloat16), mats_ref[li, 0:H, 3 * H:4 * H],
                       preferred_element_type=jnp.float32)
        attn = attn + vecs_ref[li, VEC_AO_B:VEC_AO_B + 1, 0:H]
        h = layernorm(attn + h, vecs_ref[li, VEC_LN1_G:VEC_LN1_G + 1, 0:H],
                      vecs_ref[li, VEC_LN1_B:VEC_LN1_B + 1, 0:H])

        inter = jnp.dot(h.astype(jnp.bfloat16), mats_ref[li, H:2 * H, 0:I],
                        preferred_element_type=jnp.float32)
        inter = gelu(inter + vecs_ref[li, VEC_FFN_B1:VEC_FFN_B1 + 1, 0:I])
        ffn = jnp.dot(inter.astype(jnp.bfloat16), mats_ref[li, 2 * H:2 * H + I, 0:H],
                      preferred_element_type=jnp.float32)
        ffn = ffn + vecs_ref[li, VEC_FFN_B2:VEC_FFN_B2 + 1, 0:H]
        h = layernorm(ffn + h, vecs_ref[li, VEC_LN2_G:VEC_LN2_G + 1, 0:H],
                      vecs_ref[li, VEC_LN2_B:VEC_LN2_B + 1, 0:H])

    # ----- pooler: tanh(Linear(h[:, 0])) -----
    cls = jnp.concatenate([h[b * S:b * S + 1, :] for b in range(B)], axis=0)   # (B, H)
    pooled = jnp.tanh(
        jnp.dot(cls, misc_ref[MISC_POOL_W:MISC_POOL_W + H, 0:H],
                preferred_element_type=jnp.float32)
        + misc_ref[MISC_POOL_B:MISC_POOL_B + 1, 0:H])

    # ----- fused classifier heads -----
    n1 = NUM_SENT + ADV_DIM
    z1 = jnp.dot(pooled, misc_ref[MISC_HEAD1_W:MISC_HEAD1_W + H, 0:n1],
                 preferred_element_type=jnp.float32) \
        + misc_ref[MISC_HEAD1_B:MISC_HEAD1_B + 1, 0:n1]                  # (B, 15)
    adv_in = jnp.tanh(z1[:, NUM_SENT:])                                  # (B, 12)
    adv = jnp.dot(adv_in, misc_ref[MISC_ADV2_W:MISC_ADV2_W + ADV_DIM, 0:ADV_DIM],
                  preferred_element_type=jnp.float32) \
        + misc_ref[MISC_ADV2_B:MISC_ADV2_B + 1, 0:ADV_DIM]               # (B, 12)

    sent_ref[...] = z1[:, 0:NUM_SENT]
    adv_ref[...] = adv


# ----------------- model forward -----------------
def adversarial_bert_forward(params, input_ids, attention_mask, lmbda):
    del lmbda  # ReverseLayerF gradient-reversal scale: identity in the forward pass
    B, S = input_ids.shape

    ids = input_ids.reshape(B * S, 1).astype(jnp.int32)
    mask = attention_mask.astype(jnp.float32).reshape(B, 1, S)

    kernel = functools.partial(_fused_forward_kernel, B=B, S=S)
    vmem = pl.BlockSpec(memory_space=pltpu.MemorySpace.VMEM)

    sent, adv = pl.pallas_call(
        kernel,
        out_shape=(jax.ShapeDtypeStruct((B, NUM_SENT), jnp.float32),
                   jax.ShapeDtypeStruct((B, ADV_DIM), jnp.float32)),
        in_specs=[vmem] * 5,
        out_specs=(vmem, vmem),
    )(ids, mask, params["layer_mats"], params["layer_vecs"], params["misc"])

    language_logits = [adv[:, i * NUM_LANG:(i + 1) * NUM_LANG] for i in range(ADV_HEADS)]
    return sent, language_logits


# ----------------- deterministic parameter init (pre-packed slabs) -----------------
def init_params(key):
    keys = iter(jax.random.split(key, 128))

    def dense(fan_in, fan_out):
        kw, kb = jax.random.split(next(keys))
        return (0.02 * jax.random.normal(kw, (fan_in, fan_out), jnp.float32),
                0.02 * jax.random.normal(kb, (fan_out,), jnp.float32))

    # ---- misc slab: embeddings + emb-LN + pooler + heads ----
    misc = jnp.zeros((MISC_ROWS, LANES), jnp.float32)
    word = 0.02 * jax.random.normal(next(keys), (VOCAB, HIDDEN), jnp.float32)
    pos = 0.02 * jax.random.normal(next(keys), (MAX_POS, HIDDEN), jnp.float32)
    typ = 0.02 * jax.random.normal(next(keys), (TYPE_VOCAB, HIDDEN), jnp.float32)
    misc = misc.at[MISC_WORD:MISC_WORD + VOCAB, 0:HIDDEN].set(word)
    misc = misc.at[MISC_POS:MISC_POS + MAX_POS, 0:HIDDEN].set(pos)
    misc = misc.at[MISC_TYPE, 0:HIDDEN].set(typ[0])
    misc = misc.at[MISC_ELN_G, 0:HIDDEN].set(1.0)                 # gamma=1, beta stays 0

    pool_w, pool_b = dense(HIDDEN, HIDDEN)
    misc = misc.at[MISC_POOL_W:MISC_POOL_W + HIDDEN, 0:HIDDEN].set(pool_w)
    misc = misc.at[MISC_POOL_B, 0:HIDDEN].set(pool_b)

    # sentiment head (Dropout->Linear) + 3 adversarial heads (Dropout->Linear->Tanh->Dropout->Linear)
    sent_w, sent_b = dense(HIDDEN, NUM_SENT)
    w1s, b1s, w2s, b2s = [], [], [], []
    for _ in range(ADV_HEADS):
        w1, b1 = dense(HIDDEN, NUM_LANG)
        w2, b2 = dense(NUM_LANG, NUM_LANG)
        w1s.append(w1); b1s.append(b1); w2s.append(w2); b2s.append(b2)
    head1_w = jnp.concatenate([sent_w] + w1s, axis=1)             # (H, 3 + 12)
    head1_b = jnp.concatenate([sent_b] + b1s)                     # (15,)
    misc = misc.at[MISC_HEAD1_W:MISC_HEAD1_W + HIDDEN, 0:NUM_SENT + ADV_DIM].set(head1_w)
    misc = misc.at[MISC_HEAD1_B, 0:NUM_SENT + ADV_DIM].set(head1_b)
    for i, w2 in enumerate(w2s):                                  # block-diagonal stage 2
        misc = misc.at[MISC_ADV2_W + i * NUM_LANG:MISC_ADV2_W + (i + 1) * NUM_LANG,
                       i * NUM_LANG:(i + 1) * NUM_LANG].set(w2)
    misc = misc.at[MISC_ADV2_B, 0:ADV_DIM].set(jnp.concatenate(b2s))

    # ---- per-layer slabs ----
    mats = jnp.zeros((N_LAYERS, MAT_ROWS, LANES), jnp.float32)
    vecs = jnp.zeros((N_LAYERS, VEC_ROWS, LANES), jnp.float32)
    scale = 1.0 / math.sqrt(HEAD_DIM)
    for li in range(N_LAYERS):
        wq, bq = dense(HIDDEN, HIDDEN)
        wk, bk = dense(HIDDEN, HIDDEN)
        wv, bv = dense(HIDDEN, HIDDEN)
        wq, bq = wq * scale, bq * scale                           # fold 1/sqrt(head_dim) into Q
        qkv_w = jnp.concatenate([wq, wk, wv], axis=1)             # (H, 3H)
        qkv_b = jnp.concatenate([bq, bk, bv])                     # (3H,)
        wo, bo = dense(HIDDEN, HIDDEN)
        wi, bi = dense(HIDDEN, INTERMEDIATE)
        wo2, bo2 = dense(INTERMEDIATE, HIDDEN)

        mats = mats.at[li, 0:HIDDEN, 0:3 * HIDDEN].set(qkv_w)
        mats = mats.at[li, 0:HIDDEN, 3 * HIDDEN:4 * HIDDEN].set(wo)
        mats = mats.at[li, HIDDEN:2 * HIDDEN, 0:INTERMEDIATE].set(wi)
        mats = mats.at[li, 2 * HIDDEN:2 * HIDDEN + INTERMEDIATE, 0:HIDDEN].set(wo2)

        vecs = vecs.at[li, VEC_QKV_B, 0:3 * HIDDEN].set(qkv_b)
        vecs = vecs.at[li, VEC_AO_B, 0:HIDDEN].set(bo)
        vecs = vecs.at[li, VEC_LN1_G, 0:HIDDEN].set(1.0)
        vecs = vecs.at[li, VEC_FFN_B1, 0:INTERMEDIATE].set(bi)
        vecs = vecs.at[li, VEC_FFN_B2, 0:HIDDEN].set(bo2)
        vecs = vecs.at[li, VEC_LN2_G, 0:HIDDEN].set(1.0)          # LN betas stay 0

    return {
        "misc": misc,                                             # f32
        "layer_mats": mats.astype(jnp.bfloat16),                  # bf16 MXU operands
        "layer_vecs": vecs,                                       # f32 (VPU adds)
    }


# ----------------- demo -----------------
if __name__ == "__main__":
    B, S = 2, 8
    root = jax.random.PRNGKey(0)
    k_ids, k_params = jax.random.split(root)

    input_ids = jax.random.randint(k_ids, (B, S), 0, VOCAB, dtype=jnp.int32)
    attention_mask = jnp.ones((B, S), dtype=jnp.float32).at[1, 6:].set(0.0)
    lmbda = 1.0

    params = init_params(k_params)

    fwd = jax.jit(adversarial_bert_forward)
    sentiment_logits, language_logits = fwd(params, input_ids, attention_mask, lmbda)

    jax.block_until_ready(sentiment_logits)
    for out in language_logits:
        jax.block_until_ready(out)

    assert sentiment_logits.shape == (B, NUM_SENT)
    assert len(language_logits) == ADV_HEADS
    assert all(o.shape == (B, NUM_LANG) for o in language_logits)

    print("KERNEL_OK")
</pallas_src>

<mosaic_0001>
module attributes {stable_mosaic.version = 11 : i64} {
  func.func @_fused_forward_kernel(%arg0: memref<16x1xi32, #tpu.memory_space<vmem>>, %arg1: memref<2x1x8xf32, #tpu.memory_space<vmem>>, %arg2: memref<2x192x128xbf16, #tpu.memory_space<vmem>>, %arg3: memref<2x8x128xf32, #tpu.memory_space<vmem>>, %arg4: memref<248x128xf32, #tpu.memory_space<vmem>>, %arg5: memref<2x3xf32, #tpu.memory_space<vmem>>, %arg6: memref<2x12xf32, #tpu.memory_space<vmem>>) attributes {dimension_semantics = [], scalar_prefetch = 0 : i64, scratch_operands = 0 : i64, tpu.core_type = #tpu.core_type<tc>} {
    %c0 = arith.constant 0 : index
    %c0_0 = arith.constant 0 : index
    %0 = vector.load %arg0[%c0, %c0_0] : memref<16x1xi32, #tpu.memory_space<vmem>>, vector<16x1xi32>
    %1 = tpu.iota {dimensions = array<i32: 1>} : vector<16x128xi32>
    %2 = vector.broadcast %0 : vector<16x1xi32> to vector<16x128xi32>
    %3 = arith.cmpi eq, %1, %2 : vector<16x128xi32>
    %4 = arith.extui %3 : vector<16x128xi1> to vector<16x128xi32>
    %5 = arith.sitofp %4 : vector<16x128xi32> to vector<16x128xf32>
    %c0_1 = arith.constant 0 : index
    %c0_2 = arith.constant 0 : index
    %6 = vector.load %arg4[%c0_1, %c0_2] : memref<248x128xf32, #tpu.memory_space<vmem>>, vector<128x32xf32>
    %cst = arith.constant dense<0.000000e+00> : vector<16x32xf32>
    %7 = tpu.matmul %5, %6, %cst {dimension_numbers = #tpu.dot_dimension_numbers<[1], [0], [0], [1], [0, 0, 1, 1], [], []>} : vector<16x128xf32>, vector<128x32xf32>, vector<16x32xf32> -> vector<16x32xf32>
    %c128 = arith.constant 128 : index
    %c0_3 = arith.constant 0 : index
    %8 = vector.load %arg4[%c128, %c0_3] : memref<248x128xf32, #tpu.memory_space<vmem>>, vector<8x32xf32>
    %9 = tpu.concatenate %8, %8 in 0 : vector<8x32xf32>, vector<8x32xf32> -> vector<16x32xf32>
    %10 = arith.addf %7, %9 : vector<16x32xf32>
    %c144 = arith.constant 144 : index
    %c0_4 = arith.constant 0 : index
    %11 = vector.load %arg4[%c144, %c0_4] : memref<248x128xf32, #tpu.memory_space<vmem>>, vector<1x32xf32>
    %12 = vector.broadcast %11 : vector<1x32xf32> to vector<16x32xf32>
    %13 = arith.addf %10, %12 : vector<16x32xf32>
    %c145 = arith.constant 145 : index
    %c0_5 = arith.constant 0 : index
    %14 = vector.load %arg4[%c145, %c0_5] : memref<248x128xf32, #tpu.memory_space<vmem>>, vector<1x32xf32>
    %c146 = arith.constant 146 : index
    %c0_6 = arith.constant 0 : index
    %15 = vector.load %arg4[%c146, %c0_6] : memref<248x128xf32, #tpu.memory_space<vmem>>, vector<1x32xf32>
    %cst_7 = arith.constant dense<0.000000e+00> : vector<16xf32>
    %16 = vector.multi_reduction <add>, %13, %cst_7 [1] : vector<16x32xf32> to vector<16xf32>
    %17 = vector.shape_cast %16 : vector<16xf32> to vector<16x1xf32>
    %cst_8 = arith.constant 3.200000e+01 : f32
    %18 = vector.broadcast %cst_8 : f32 to vector<16x1xf32>
    %19 = arith.divf %17, %18 : vector<16x1xf32>
    %20 = vector.broadcast %19 : vector<16x1xf32> to vector<16x32xf32>
    %21 = arith.subf %13, %20 : vector<16x32xf32>
    %22 = arith.mulf %21, %21 : vector<16x32xf32>
    %cst_9 = arith.constant dense<0.000000e+00> : vector<16xf32>
    %23 = vector.multi_reduction <add>, %22, %cst_9 [1] : vector<16x32xf32> to vector<16xf32>
    %24 = vector.shape_cast %23 : vector<16xf32> to vector<16x1xf32>
    %cst_10 = arith.constant 3.200000e+01 : f32
    %25 = vector.broadcast %cst_10 : f32 to vector<16x1xf32>
    %26 = arith.divf %24, %25 : vector<16x1xf32>
    %27 = vector.broadcast %19 : vector<16x1xf32> to vector<16x32xf32>
    %28 = arith.subf %13, %27 : vector<16x32xf32>
    %cst_11 = arith.constant 9.99999996E-13 : f32
    %29 = vector.broadcast %cst_11 : f32 to vector<16x1xf32>
    %30 = arith.addf %26, %29 : vector<16x1xf32>
    %31 = math.rsqrt %30 : vector<16x1xf32>
    %32 = vector.broadcast %31 : vector<16x1xf32> to vector<16x32xf32>
    %33 = arith.mulf %28, %32 : vector<16x32xf32>
    %34 = vector.broadcast %14 : vector<1x32xf32> to vector<16x32xf32>
    %35 = arith.mulf %33, %34 : vector<16x32xf32>
    %36 = vector.broadcast %15 : vector<1x32xf32> to vector<16x32xf32>
    %37 = arith.addf %35, %36 : vector<16x32xf32>
    %c0_12 = arith.constant 0 : index
    %c0_13 = arith.constant 0 : index
    %c0_14 = arith.constant 0 : index
    %38 = vector.load %arg1[%c0_12, %c0_13, %c0_14] : memref<2x1x8xf32, #tpu.memory_space<vmem>>, vector<2x1x8xf32>
    %cst_15 = arith.constant 1.000000e+00 : f32
    %39 = vector.broadcast %cst_15 : f32 to vector<2x1x8xf32>
    %40 = arith.subf %39, %38 : vector<2x1x8xf32>
    %cst_16 = arith.constant -1.000000e+04 : f32
    %41 = vector.broadcast %cst_16 : f32 to vector<2x1x8xf32>
    %42 = arith.mulf %40, %41 : vector<2x1x8xf32>
    %43 = tpu.concatenate %42, %42 in 0 : vector<2x1x8xf32>, vector<2x1x8xf32> -> vector<4x1x8xf32>
    %44 = arith.truncf %37 : vector<16x32xf32> to vector<16x32xbf16>
    %c0_17 = arith.constant 0 : index
    %c0_18 = arith.constant 0 : index
    %c0_19 = arith.constant 0 : index
    %45 = vector.load %arg2[%c0_17, %c0_18, %c0_19] : memref<2x192x128xbf16, #tpu.memory_space<vmem>>, vector<1x32x96xbf16>
    %46 = vector.shape_cast %45 : vector<1x32x96xbf16> to vector<32x96xbf16>
    %cst_20 = arith.constant dense<0.000000e+00> : vector<16x96xf32>
    %47 = tpu.matmul %44, %46, %cst_20 {dimension_numbers = #tpu.dot_dimension_numbers<[1], [0], [0], [1], [0, 0, 1, 1], [], []>} : vector<16x32xbf16>, vector<32x96xbf16>, vector<16x96xf32> -> vector<16x96xf32>
    %c0_21 = arith.constant 0 : index
    %c0_22 = arith.constant 0 : index
    %c0_23 = arith.constant 0 : index
    %48 = vector.load %arg3[%c0_21, %c0_22, %c0_23] : memref<2x8x128xf32, #tpu.memory_space<vmem>>, vector<1x1x96xf32>
    %49 = vector.shape_cast %48 : vector<1x1x96xf32> to vector<1x96xf32>
    %50 = vector.broadcast %49 : vector<1x96xf32> to vector<16x96xf32>
    %51 = arith.addf %47, %50 : vector<16x96xf32>
    %52 = vector.shape_cast %51 : vector<16x96xf32> to vector<2x8x96xf32>
    %53 = vector.extract_strided_slice %52 {offsets = [0, 0, 0], sizes = [2, 8, 16], strides = [1, 1, 1]} : vector<2x8x96xf32> to vector<2x8x16xf32>
    %54 = vector.extract_strided_slice %52 {offsets = [0, 0, 16], sizes = [2, 8, 16], strides = [1, 1, 1]} : vector<2x8x96xf32> to vector<2x8x16xf32>
    %55 = tpu.concatenate %53, %54 in 0 : vector<2x8x16xf32>, vector<2x8x16xf32> -> vector<4x8x16xf32>
    %56 = vector.extract_strided_slice %52 {offsets = [0, 0, 32], sizes = [2, 8, 16], strides = [1, 1, 1]} : vector<2x8x96xf32> to vector<2x8x16xf32>
    %57 = vector.extract_strided_slice %52 {offsets = [0, 0, 48], sizes = [2, 8, 16], strides = [1, 1, 1]} : vector<2x8x96xf32> to vector<2x8x16xf32>
    %58 = tpu.concatenate %56, %57 in 0 : vector<2x8x16xf32>, vector<2x8x16xf32> -> vector<4x8x16xf32>
    %59 = vector.extract_strided_slice %52 {offsets = [0, 0, 64], sizes = [2, 8, 16], strides = [1, 1, 1]} : vector<2x8x96xf32> to vector<2x8x16xf32>
    %60 = vector.extract_strided_slice %52 {offsets = [0, 0, 80], sizes = [2, 8, 16], strides = [1, 1, 1]} : vector<2x8x96xf32> to vector<2x8x16xf32>
    %61 = tpu.concatenate %59, %60 in 0 : vector<2x8x16xf32>, vector<2x8x16xf32> -> vector<4x8x16xf32>
    "tpu.trace_start"() <{level = 10 : i32, message = "gqd,gkd->gqk"}> : () -> ()
    %cst_24 = arith.constant dense<0.000000e+00> : vector<4x8x8xf32>
    %62 = tpu.matmul %55, %58, %cst_24 {dimension_numbers = #tpu.dot_dimension_numbers<[2], [2], [1], [1], [0, 0, 0, 1, 1, 1], [0], [0]>} : vector<4x8x16xf32>, vector<4x8x16xf32>, vector<4x8x8xf32> -> vector<4x8x8xf32>
    "tpu.trace_stop"() : () -> ()
    %63 = vector.broadcast %43 : vector<4x1x8xf32> to vector<4x8x8xf32>
    %64 = arith.addf %62, %63 : vector<4x8x8xf32>
    %cst_25 = arith.constant dense<0xFF800000> : vector<4x8xf32>
    %65 = vector.multi_reduction <maximumf>, %64, %cst_25 [2] : vector<4x8x8xf32> to vector<4x8xf32>
    %66 = vector.shape_cast %65 : vector<4x8xf32> to vector<4x8x1xf32>
    %67 = vector.broadcast %66 : vector<4x8x1xf32> to vector<4x8x8xf32>
    %68 = arith.subf %64, %67 : vector<4x8x8xf32>
    %69 = math.exp %68 : vector<4x8x8xf32>
    %cst_26 = arith.constant dense<0.000000e+00> : vector<4x8xf32>
    %70 = vector.multi_reduction <add>, %69, %cst_26 [2] : vector<4x8x8xf32> to vector<4x8xf32>
    %71 = vector.shape_cast %70 : vector<4x8xf32> to vector<4x8x1xf32>
    %72 = vector.broadcast %71 : vector<4x8x1xf32> to vector<4x8x8xf32>
    %73 = arith.divf %69, %72 : vector<4x8x8xf32>
    "tpu.trace_start"() <{level = 10 : i32, message = "gqk,gkd->gqd"}> : () -> ()
    %cst_27 = arith.constant dense<0.000000e+00> : vector<4x8x16xf32>
    %74 = tpu.matmul %73, %61, %cst_27 {dimension_numbers = #tpu.dot_dimension_numbers<[2], [1], [1], [2], [0, 0, 0, 1, 1, 2], [0], [0]>} : vector<4x8x8xf32>, vector<4x8x16xf32>, vector<4x8x16xf32> -> vector<4x8x16xf32>
    "tpu.trace_stop"() : () -> ()
    %75 = vector.extract_strided_slice %74 {offsets = [0, 0, 0], sizes = [2, 8, 16], strides = [1, 1, 1]} : vector<4x8x16xf32> to vector<2x8x16xf32>
    %76 = vector.extract_strided_slice %74 {offsets = [2, 0, 0], sizes = [2, 8, 16], strides = [1, 1, 1]} : vector<4x8x16xf32> to vector<2x8x16xf32>
    %77 = tpu.concatenate %75, %76 in 2 : vector<2x8x16xf32>, vector<2x8x16xf32> -> vector<2x8x32xf32>
    %78 = vector.shape_cast %77 : vector<2x8x32xf32> to vector<16x32xf32>
    %79 = arith.truncf %78 : vector<16x32xf32> to vector<16x32xbf16>
    %c0_28 = arith.constant 0 : index
    %c0_29 = arith.constant 0 : index
    %c96 = arith.constant 96 : index
    %80 = vector.load %arg2[%c0_28, %c0_29, %c96] : memref<2x192x128xbf16, #tpu.memory_space<vmem>>, vector<1x32x32xbf16>
    %81 = vector.shape_cast %80 : vector<1x32x32xbf16> to vector<32x32xbf16>
    %cst_30 = arith.constant dense<0.000000e+00> : vector<16x32xf32>
    %82 = tpu.matmul %79, %81, %cst_30 {dimension_numbers = #tpu.dot_dimension_numbers<[1], [0], [0], [1], [0, 0, 1, 1], [], []>} : vector<16x32xbf16>, vector<32x32xbf16>, vector<16x32xf32> -> vector<16x32xf32>
    %c0_31 = arith.constant 0 : index
    %c1 = arith.constant 1 : index
    %c0_32 = arith.constant 0 : index
    %83 = vector.load %arg3[%c0_31, %c1, %c0_32] : memref<2x8x128xf32, #tpu.memory_space<vmem>>, vector<1x1x32xf32>
    %84 = vector.shape_cast %83 : vector<1x1x32xf32> to vector<1x32xf32>
    %85 = vector.broadcast %84 : vector<1x32xf32> to vector<16x32xf32>
    %86 = arith.addf %82, %85 : vector<16x32xf32>
    %87 = arith.addf %86, %37 : vector<16x32xf32>
    %c0_33 = arith.constant 0 : index
    %c2 = arith.constant 2 : index
    %c0_34 = arith.constant 0 : index
    %88 = vector.load %arg3[%c0_33, %c2, %c0_34] : memref<2x8x128xf32, #tpu.memory_space<vmem>>, vector<1x1x32xf32>
    %89 = vector.shape_cast %88 : vector<1x1x32xf32> to vector<1x32xf32>
    %c0_35 = arith.constant 0 : index
    %c3 = arith.constant 3 : index
    %c0_36 = arith.constant 0 : index
    %90 = vector.load %arg3[%c0_35, %c3, %c0_36] : memref<2x8x128xf32, #tpu.memory_space<vmem>>, vector<1x1x32xf32>
    %91 = vector.shape_cast %90 : vector<1x1x32xf32> to vector<1x32xf32>
    %cst_37 = arith.constant dense<0.000000e+00> : vector<16xf32>
    %92 = vector.multi_reduction <add>, %87, %cst_37 [1] : vector<16x32xf32> to vector<16xf32>
    %93 = vector.shape_cast %92 : vector<16xf32> to vector<16x1xf32>
    %cst_38 = arith.constant 3.200000e+01 : f32
    %94 = vector.broadcast %cst_38 : f32 to vector<16x1xf32>
    %95 = arith.divf %93, %94 : vector<16x1xf32>
    %96 = vector.broadcast %95 : vector<16x1xf32> to vector<16x32xf32>
    %97 = arith.subf %87, %96 : vector<16x32xf32>
    %98 = arith.mulf %97, %97 : vector<16x32xf32>
    %cst_39 = arith.constant dense<0.000000e+00> : vector<16xf32>
    %99 = vector.multi_reduction <add>, %98, %cst_39 [1] : vector<16x32xf32> to vector<16xf32>
    %100 = vector.shape_cast %99 : vector<16xf32> to vector<16x1xf32>
    %cst_40 = arith.constant 3.200000e+01 : f32
    %101 = vector.broadcast %cst_40 : f32 to vector<16x1xf32>
    %102 = arith.divf %100, %101 : vector<16x1xf32>
    %103 = vector.broadcast %95 : vector<16x1xf32> to vector<16x32xf32>
    %104 = arith.subf %87, %103 : vector<16x32xf32>
    %cst_41 = arith.constant 9.99999996E-13 : f32
    %105 = vector.broadcast %cst_41 : f32 to vector<16x1xf32>
    %106 = arith.addf %102, %105 : vector<16x1xf32>
    %107 = math.rsqrt %106 : vector<16x1xf32>
    %108 = vector.broadcast %107 : vector<16x1xf32> to vector<16x32xf32>
    %109 = arith.mulf %104, %108 : vector<16x32xf32>
    %110 = vector.broadcast %89 : vector<1x32xf32> to vector<16x32xf32>
    %111 = arith.mulf %109, %110 : vector<16x32xf32>
    %112 = vector.broadcast %91 : vector<1x32xf32> to vector<16x32xf32>
    %113 = arith.addf %111, %112 : vector<16x32xf32>
    %114 = arith.truncf %113 : vector<16x32xf32> to vector<16x32xbf16>
    %c0_42 = arith.constant 0 : index
    %c32 = arith.constant 32 : index
    %c0_43 = arith.constant 0 : index
    %115 = vector.load %arg2[%c0_42, %c32, %c0_43] : memref<2x192x128xbf16, #tpu.memory_space<vmem>>, vector<1x32x128xbf16>
    %116 = vector.shape_cast %115 : vector<1x32x128xbf16> to vector<32x128xbf16>
    %cst_44 = arith.constant dense<0.000000e+00> : vector<16x128xf32>
    %117 = tpu.matmul %114, %116, %cst_44 {dimension_numbers = #tpu.dot_dimension_numbers<[1], [0], [0], [1], [0, 0, 1, 1], [], []>} : vector<16x32xbf16>, vector<32x128xbf16>, vector<16x128xf32> -> vector<16x128xf32>
    %c0_45 = arith.constant 0 : index
    %c4 = arith.constant 4 : index
    %c0_46 = arith.constant 0 : index
    %118 = vector.load %arg3[%c0_45, %c4, %c0_46] : memref<2x8x128xf32, #tpu.memory_space<vmem>>, vector<1x1x128xf32>
    %119 = vector.shape_cast %118 : vector<1x1x128xf32> to vector<1x128xf32>
    %120 = vector.broadcast %119 : vector<1x128xf32> to vector<16x128xf32>
    %121 = arith.addf %117, %120 : vector<16x128xf32>
    %cst_47 = arith.constant 5.000000e-01 : f32
    %122 = vector.broadcast %cst_47 : f32 to vector<16x128xf32>
    %123 = arith.mulf %122, %121 : vector<16x128xf32>
    %cst_48 = arith.constant 4.471500e-02 : f32
    %124 = vector.broadcast %cst_48 : f32 to vector<16x128xf32>
    %125 = arith.mulf %124, %121 : vector<16x128xf32>
    %126 = arith.mulf %125, %121 : vector<16x128xf32>
    %127 = arith.mulf %126, %121 : vector<16x128xf32>
    %128 = arith.addf %121, %127 : vector<16x128xf32>
    %cst_49 = arith.constant 0.797884583 : f32
    %129 = vector.broadcast %cst_49 : f32 to vector<16x128xf32>
    %130 = arith.mulf %129, %128 : vector<16x128xf32>
    %131 = math.tanh %130 : vector<16x128xf32>
    %cst_50 = arith.constant 1.000000e+00 : f32
    %132 = vector.broadcast %cst_50 : f32 to vector<16x128xf32>
    %133 = arith.addf %132, %131 : vector<16x128xf32>
    %134 = arith.mulf %123, %133 : vector<16x128xf32>
    %135 = arith.truncf %134 : vector<16x128xf32> to vector<16x128xbf16>
    %c0_51 = arith.constant 0 : index
    %c64 = arith.constant 64 : index
    %c0_52 = arith.constant 0 : index
    %136 = vector.load %arg2[%c0_51, %c64, %c0_52] : memref<2x192x128xbf16, #tpu.memory_space<vmem>>, vector<1x128x32xbf16>
    %137 = vector.shape_cast %136 : vector<1x128x32xbf16> to vector<128x32xbf16>
    %cst_53 = arith.constant dense<0.000000e+00> : vector<16x32xf32>
    %138 = tpu.matmul %135, %137, %cst_53 {dimension_numbers = #tpu.dot_dimension_numbers<[1], [0], [0], [1], [0, 0, 1, 1], [], []>} : vector<16x128xbf16>, vector<128x32xbf16>, vector<16x32xf32> -> vector<16x32xf32>
    %c0_54 = arith.constant 0 : index
    %c5 = arith.constant 5 : index
    %c0_55 = arith.constant 0 : index
    %139 = vector.load %arg3[%c0_54, %c5, %c0_55] : memref<2x8x128xf32, #tpu.memory_space<vmem>>, vector<1x1x32xf32>
    %140 = vector.shape_cast %139 : vector<1x1x32xf32> to vector<1x32xf32>
    %141 = vector.broadcast %140 : vector<1x32xf32> to vector<16x32xf32>
    %142 = arith.addf %138, %141 : vector<16x32xf32>
    %143 = arith.addf %142, %113 : vector<16x32xf32>
    %c0_56 = arith.constant 0 : index
    %c6 = arith.constant 6 : index
    %c0_57 = arith.constant 0 : index
    %144 = vector.load %arg3[%c0_56, %c6, %c0_57] : memref<2x8x128xf32, #tpu.memory_space<vmem>>, vector<1x1x32xf32>
    %145 = vector.shape_cast %144 : vector<1x1x32xf32> to vector<1x32xf32>
    %c0_58 = arith.constant 0 : index
    %c7 = arith.constant 7 : index
    %c0_59 = arith.constant 0 : index
    %146 = vector.load %arg3[%c0_58, %c7, %c0_59] : memref<2x8x128xf32, #tpu.memory_space<vmem>>, vector<1x1x32xf32>
    %147 = vector.shape_cast %146 : vector<1x1x32xf32> to vector<1x32xf32>
    %cst_60 = arith.constant dense<0.000000e+00> : vector<16xf32>
    %148 = vector.multi_reduction <add>, %143, %cst_60 [1] : vector<16x32xf32> to vector<16xf32>
    %149 = vector.shape_cast %148 : vector<16xf32> to vector<16x1xf32>
    %cst_61 = arith.constant 3.200000e+01 : f32
    %150 = vector.broadcast %cst_61 : f32 to vector<16x1xf32>
    %151 = arith.divf %149, %150 : vector<16x1xf32>
    %152 = vector.broadcast %151 : vector<16x1xf32> to vector<16x32xf32>
    %153 = arith.subf %143, %152 : vector<16x32xf32>
    %154 = arith.mulf %153, %153 : vector<16x32xf32>
    %cst_62 = arith.constant dense<0.000000e+00> : vector<16xf32>
    %155 = vector.multi_reduction <add>, %154, %cst_62 [1] : vector<16x32xf32> to vector<16xf32>
    %156 = vector.shape_cast %155 : vector<16xf32> to vector<16x1xf32>
    %cst_63 = arith.constant 3.200000e+01 : f32
    %157 = vector.broadcast %cst_63 : f32 to vector<16x1xf32>
    %158 = arith.divf %156, %157 : vector<16x1xf32>
    %159 = vector.broadcast %151 : vector<16x1xf32> to vector<16x32xf32>
    %160 = arith.subf %143, %159 : vector<16x32xf32>
    %cst_64 = arith.constant 9.99999996E-13 : f32
    %161 = vector.broadcast %cst_64 : f32 to vector<16x1xf32>
    %162 = arith.addf %158, %161 : vector<16x1xf32>
    %163 = math.rsqrt %162 : vector<16x1xf32>
    %164 = vector.broadcast %163 : vector<16x1xf32> to vector<16x32xf32>
    %165 = arith.mulf %160, %164 : vector<16x32xf32>
    %166 = vector.broadcast %145 : vector<1x32xf32> to vector<16x32xf32>
    %167 = arith.mulf %165, %166 : vector<16x32xf32>
    %168 = vector.broadcast %147 : vector<1x32xf32> to vector<16x32xf32>
    %169 = arith.addf %167, %168 : vector<16x32xf32>
    %170 = arith.truncf %169 : vector<16x32xf32> to vector<16x32xbf16>
    %c1_65 = arith.constant 1 : index
    %c0_66 = arith.constant 0 : index
    %c0_67 = arith.constant 0 : index
    %171 = vector.load %arg2[%c1_65, %c0_66, %c0_67] : memref<2x192x128xbf16, #tpu.memory_space<vmem>>, vector<1x32x96xbf16>
    %172 = vector.shape_cast %171 : vector<1x32x96xbf16> to vector<32x96xbf16>
    %cst_68 = arith.constant dense<0.000000e+00> : vector<16x96xf32>
    %173 = tpu.matmul %170, %172, %cst_68 {dimension_numbers = #tpu.dot_dimension_numbers<[1], [0], [0], [1], [0, 0, 1, 1], [], []>} : vector<16x32xbf16>, vector<32x96xbf16>, vector<16x96xf32> -> vector<16x96xf32>
    %c1_69 = arith.constant 1 : index
    %c0_70 = arith.constant 0 : index
    %c0_71 = arith.constant 0 : index
    %174 = vector.load %arg3[%c1_69, %c0_70, %c0_71] : memref<2x8x128xf32, #tpu.memory_space<vmem>>, vector<1x1x96xf32>
    %175 = vector.shape_cast %174 : vector<1x1x96xf32> to vector<1x96xf32>
    %176 = vector.broadcast %175 : vector<1x96xf32> to vector<16x96xf32>
    %177 = arith.addf %173, %176 : vector<16x96xf32>
    %178 = vector.shape_cast %177 : vector<16x96xf32> to vector<2x8x96xf32>
    %179 = vector.extract_strided_slice %178 {offsets = [0, 0, 0], sizes = [2, 8, 16], strides = [1, 1, 1]} : vector<2x8x96xf32> to vector<2x8x16xf32>
    %180 = vector.extract_strided_slice %178 {offsets = [0, 0, 16], sizes = [2, 8, 16], strides = [1, 1, 1]} : vector<2x8x96xf32> to vector<2x8x16xf32>
    %181 = tpu.concatenate %179, %180 in 0 : vector<2x8x16xf32>, vector<2x8x16xf32> -> vector<4x8x16xf32>
    %182 = vector.extract_strided_slice %178 {offsets = [0, 0, 32], sizes = [2, 8, 16], strides = [1, 1, 1]} : vector<2x8x96xf32> to vector<2x8x16xf32>
    %183 = vector.extract_strided_slice %178 {offsets = [0, 0, 48], sizes = [2, 8, 16], strides = [1, 1, 1]} : vector<2x8x96xf32> to vector<2x8x16xf32>
    %184 = tpu.concatenate %182, %183 in 0 : vector<2x8x16xf32>, vector<2x8x16xf32> -> vector<4x8x16xf32>
    %185 = vector.extract_strided_slice %178 {offsets = [0, 0, 64], sizes = [2, 8, 16], strides = [1, 1, 1]} : vector<2x8x96xf32> to vector<2x8x16xf32>
    %186 = vector.extract_strided_slice %178 {offsets = [0, 0, 80], sizes = [2, 8, 16], strides = [1, 1, 1]} : vector<2x8x96xf32> to vector<2x8x16xf32>
    %187 = tpu.concatenate %185, %186 in 0 : vector<2x8x16xf32>, vector<2x8x16xf32> -> vector<4x8x16xf32>
    "tpu.trace_start"() <{level = 10 : i32, message = "gqd,gkd->gqk"}> : () -> ()
    %cst_72 = arith.constant dense<0.000000e+00> : vector<4x8x8xf32>
    %188 = tpu.matmul %181, %184, %cst_72 {dimension_numbers = #tpu.dot_dimension_numbers<[2], [2], [1], [1], [0, 0, 0, 1, 1, 1], [0], [0]>} : vector<4x8x16xf32>, vector<4x8x16xf32>, vector<4x8x8xf32> -> vector<4x8x8xf32>
    "tpu.trace_stop"() : () -> ()
    %189 = vector.broadcast %43 : vector<4x1x8xf32> to vector<4x8x8xf32>
    %190 = arith.addf %188, %189 : vector<4x8x8xf32>
    %cst_73 = arith.constant dense<0xFF800000> : vector<4x8xf32>
    %191 = vector.multi_reduction <maximumf>, %190, %cst_73 [2] : vector<4x8x8xf32> to vector<4x8xf32>
    %192 = vector.shape_cast %191 : vector<4x8xf32> to vector<4x8x1xf32>
    %193 = vector.broadcast %192 : vector<4x8x1xf32> to vector<4x8x8xf32>
    %194 = arith.subf %190, %193 : vector<4x8x8xf32>
    %195 = math.exp %194 : vector<4x8x8xf32>
    %cst_74 = arith.constant dense<0.000000e+00> : vector<4x8xf32>
    %196 = vector.multi_reduction <add>, %195, %cst_74 [2] : vector<4x8x8xf32> to vector<4x8xf32>
    %197 = vector.shape_cast %196 : vector<4x8xf32> to vector<4x8x1xf32>
    %198 = vector.broadcast %197 : vector<4x8x1xf32> to vector<4x8x8xf32>
    %199 = arith.divf %195, %198 : vector<4x8x8xf32>
    "tpu.trace_start"() <{level = 10 : i32, message = "gqk,gkd->gqd"}> : () -> ()
    %cst_75 = arith.constant dense<0.000000e+00> : vector<4x8x16xf32>
    %200 = tpu.matmul %199, %187, %cst_75 {dimension_numbers = #tpu.dot_dimension_numbers<[2], [1], [1], [2], [0, 0, 0, 1, 1, 2], [0], [0]>} : vector<4x8x8xf32>, vector<4x8x16xf32>, vector<4x8x16xf32> -> vector<4x8x16xf32>
    "tpu.trace_stop"() : () -> ()
    %201 = vector.extract_strided_slice %200 {offsets = [0, 0, 0], sizes = [2, 8, 16], strides = [1, 1, 1]} : vector<4x8x16xf32> to vector<2x8x16xf32>
    %202 = vector.extract_strided_slice %200 {offsets = [2, 0, 0], sizes = [2, 8, 16], strides = [1, 1, 1]} : vector<4x8x16xf32> to vector<2x8x16xf32>
    %203 = tpu.concatenate %201, %202 in 2 : vector<2x8x16xf32>, vector<2x8x16xf32> -> vector<2x8x32xf32>
    %204 = vector.shape_cast %203 : vector<2x8x32xf32> to vector<16x32xf32>
    %205 = arith.truncf %204 : vector<16x32xf32> to vector<16x32xbf16>
    %c1_76 = arith.constant 1 : index
    %c0_77 = arith.constant 0 : index
    %c96_78 = arith.constant 96 : index
    %206 = vector.load %arg2[%c1_76, %c0_77, %c96_78] : memref<2x192x128xbf16, #tpu.memory_space<vmem>>, vector<1x32x32xbf16>
    %207 = vector.shape_cast %206 : vector<1x32x32xbf16> to vector<32x32xbf16>
    %cst_79 = arith.constant dense<0.000000e+00> : vector<16x32xf32>
    %208 = tpu.matmul %205, %207, %cst_79 {dimension_numbers = #tpu.dot_dimension_numbers<[1], [0], [0], [1], [0, 0, 1, 1], [], []>} : vector<16x32xbf16>, vector<32x32xbf16>, vector<16x32xf32> -> vector<16x32xf32>
    %c1_80 = arith.constant 1 : index
    %c1_81 = arith.constant 1 : index
    %c0_82 = arith.constant 0 : index
    %209 = vector.load %arg3[%c1_80, %c1_81, %c0_82] : memref<2x8x128xf32, #tpu.memory_space<vmem>>, vector<1x1x32xf32>
    %210 = vector.shape_cast %209 : vector<1x1x32xf32> to vector<1x32xf32>
    %211 = vector.broadcast %210 : vector<1x32xf32> to vector<16x32xf32>
    %212 = arith.addf %208, %211 : vector<16x32xf32>
    %213 = arith.addf %212, %169 : vector<16x32xf32>
    %c1_83 = arith.constant 1 : index
    %c2_84 = arith.constant 2 : index
    %c0_85 = arith.constant 0 : index
    %214 = vector.load %arg3[%c1_83, %c2_84, %c0_85] : memref<2x8x128xf32, #tpu.memory_space<vmem>>, vector<1x1x32xf32>
    %215 = vector.shape_cast %214 : vector<1x1x32xf32> to vector<1x32xf32>
    %c1_86 = arith.constant 1 : index
    %c3_87 = arith.constant 3 : index
    %c0_88 = arith.constant 0 : index
    %216 = vector.load %arg3[%c1_86, %c3_87, %c0_88] : memref<2x8x128xf32, #tpu.memory_space<vmem>>, vector<1x1x32xf32>
    %217 = vector.shape_cast %216 : vector<1x1x32xf32> to vector<1x32xf32>
    %cst_89 = arith.constant dense<0.000000e+00> : vector<16xf32>
    %218 = vector.multi_reduction <add>, %213, %cst_89 [1] : vector<16x32xf32> to vector<16xf32>
    %219 = vector.shape_cast %218 : vector<16xf32> to vector<16x1xf32>
    %cst_90 = arith.constant 3.200000e+01 : f32
    %220 = vector.broadcast %cst_90 : f32 to vector<16x1xf32>
    %221 = arith.divf %219, %220 : vector<16x1xf32>
    %222 = vector.broadcast %221 : vector<16x1xf32> to vector<16x32xf32>
    %223 = arith.subf %213, %222 : vector<16x32xf32>
    %224 = arith.mulf %223, %223 : vector<16x32xf32>
    %cst_91 = arith.constant dense<0.000000e+00> : vector<16xf32>
    %225 = vector.multi_reduction <add>, %224, %cst_91 [1] : vector<16x32xf32> to vector<16xf32>
    %226 = vector.shape_cast %225 : vector<16xf32> to vector<16x1xf32>
    %cst_92 = arith.constant 3.200000e+01 : f32
    %227 = vector.broadcast %cst_92 : f32 to vector<16x1xf32>
    %228 = arith.divf %226, %227 : vector<16x1xf32>
    %229 = vector.broadcast %221 : vector<16x1xf32> to vector<16x32xf32>
    %230 = arith.subf %213, %229 : vector<16x32xf32>
    %cst_93 = arith.constant 9.99999996E-13 : f32
    %231 = vector.broadcast %cst_93 : f32 to vector<16x1xf32>
    %232 = arith.addf %228, %231 : vector<16x1xf32>
    %233 = math.rsqrt %232 : vector<16x1xf32>
    %234 = vector.broadcast %233 : vector<16x1xf32> to vector<16x32xf32>
    %235 = arith.mulf %230, %234 : vector<16x32xf32>
    %236 = vector.broadcast %215 : vector<1x32xf32> to vector<16x32xf32>
    %237 = arith.mulf %235, %236 : vector<16x32xf32>
    %238 = vector.broadcast %217 : vector<1x32xf32> to vector<16x32xf32>
    %239 = arith.addf %237, %238 : vector<16x32xf32>
    %240 = arith.truncf %239 : vector<16x32xf32> to vector<16x32xbf16>
    %c1_94 = arith.constant 1 : index
    %c32_95 = arith.constant 32 : index
    %c0_96 = arith.constant 0 : index
    %241 = vector.load %arg2[%c1_94, %c32_95, %c0_96] : memref<2x192x128xbf16, #tpu.memory_space<vmem>>, vector<1x32x128xbf16>
    %242 = vector.shape_cast %241 : vector<1x32x128xbf16> to vector<32x128xbf16>
    %cst_97 = arith.constant dense<0.000000e+00> : vector<16x128xf32>
    %243 = tpu.matmul %240, %242, %cst_97 {dimension_numbers = #tpu.dot_dimension_numbers<[1], [0], [0], [1], [0, 0, 1, 1], [], []>} : vector<16x32xbf16>, vector<32x128xbf16>, vector<16x128xf32> -> vector<16x128xf32>
    %c1_98 = arith.constant 1 : index
    %c4_99 = arith.constant 4 : index
    %c0_100 = arith.constant 0 : index
    %244 = vector.load %arg3[%c1_98, %c4_99, %c0_100] : memref<2x8x128xf32, #tpu.memory_space<vmem>>, vector<1x1x128xf32>
    %245 = vector.shape_cast %244 : vector<1x1x128xf32> to vector<1x128xf32>
    %246 = vector.broadcast %245 : vector<1x128xf32> to vector<16x128xf32>
    %247 = arith.addf %243, %246 : vector<16x128xf32>
    %cst_101 = arith.constant 5.000000e-01 : f32
    %248 = vector.broadcast %cst_101 : f32 to vector<16x128xf32>
    %249 = arith.mulf %248, %247 : vector<16x128xf32>
    %cst_102 = arith.constant 4.471500e-02 : f32
    %250 = vector.broadcast %cst_102 : f32 to vector<16x128xf32>
    %251 = arith.mulf %250, %247 : vector<16x128xf32>
    %252 = arith.mulf %251, %247 : vector<16x128xf32>
    %253 = arith.mulf %252, %247 : vector<16x128xf32>
    %254 = arith.addf %247, %253 : vector<16x128xf32>
    %cst_103 = arith.constant 0.797884583 : f32
    %255 = vector.broadcast %cst_103 : f32 to vector<16x128xf32>
    %256 = arith.mulf %255, %254 : vector<16x128xf32>
    %257 = math.tanh %256 : vector<16x128xf32>
    %cst_104 = arith.constant 1.000000e+00 : f32
    %258 = vector.broadcast %cst_104 : f32 to vector<16x128xf32>
    %259 = arith.addf %258, %257 : vector<16x128xf32>
    %260 = arith.mulf %249, %259 : vector<16x128xf32>
    %261 = arith.truncf %260 : vector<16x128xf32> to vector<16x128xbf16>
    %c1_105 = arith.constant 1 : index
    %c64_106 = arith.constant 64 : index
    %c0_107 = arith.constant 0 : index
    %262 = vector.load %arg2[%c1_105, %c64_106, %c0_107] : memref<2x192x128xbf16, #tpu.memory_space<vmem>>, vector<1x128x32xbf16>
    %263 = vector.shape_cast %262 : vector<1x128x32xbf16> to vector<128x32xbf16>
    %cst_108 = arith.constant dense<0.000000e+00> : vector<16x32xf32>
    %264 = tpu.matmul %261, %263, %cst_108 {dimension_numbers = #tpu.dot_dimension_numbers<[1], [0], [0], [1], [0, 0, 1, 1], [], []>} : vector<16x128xbf16>, vector<128x32xbf16>, vector<16x32xf32> -> vector<16x32xf32>
    %c1_109 = arith.constant 1 : index
    %c5_110 = arith.constant 5 : index
    %c0_111 = arith.constant 0 : index
    %265 = vector.load %arg3[%c1_109, %c5_110, %c0_111] : memref<2x8x128xf32, #tpu.memory_space<vmem>>, vector<1x1x32xf32>
    %266 = vector.shape_cast %265 : vector<1x1x32xf32> to vector<1x32xf32>
    %267 = vector.broadcast %266 : vector<1x32xf32> to vector<16x32xf32>
    %268 = arith.addf %264, %267 : vector<16x32xf32>
    %269 = arith.addf %268, %239 : vector<16x32xf32>
    %c1_112 = arith.constant 1 : index
    %c6_113 = arith.constant 6 : index
    %c0_114 = arith.constant 0 : index
    %270 = vector.load %arg3[%c1_112, %c6_113, %c0_114] : memref<2x8x128xf32, #tpu.memory_space<vmem>>, vector<1x1x32xf32>
    %271 = vector.shape_cast %270 : vector<1x1x32xf32> to vector<1x32xf32>
    %c1_115 = arith.constant 1 : index
    %c7_116 = arith.constant 7 : index
    %c0_117 = arith.constant 0 : index
    %272 = vector.load %arg3[%c1_115, %c7_116, %c0_117] : memref<2x8x128xf32, #tpu.memory_space<vmem>>, vector<1x1x32xf32>
    %273 = vector.shape_cast %272 : vector<1x1x32xf32> to vector<1x32xf32>
    %cst_118 = arith.constant dense<0.000000e+00> : vector<16xf32>
    %274 = vector.multi_reduction <add>, %269, %cst_118 [1] : vector<16x32xf32> to vector<16xf32>
    %275 = vector.shape_cast %274 : vector<16xf32> to vector<16x1xf32>
    %cst_119 = arith.constant 3.200000e+01 : f32
    %276 = vector.broadcast %cst_119 : f32 to vector<16x1xf32>
    %277 = arith.divf %275, %276 : vector<16x1xf32>
    %278 = vector.broadcast %277 : vector<16x1xf32> to vector<16x32xf32>
    %279 = arith.subf %269, %278 : vector<16x32xf32>
    %280 = arith.mulf %279, %279 : vector<16x32xf32>
    %cst_120 = arith.constant dense<0.000000e+00> : vector<16xf32>
    %281 = vector.multi_reduction <add>, %280, %cst_120 [1] : vector<16x32xf32> to vector<16xf32>
    %282 = vector.shape_cast %281 : vector<16xf32> to vector<16x1xf32>
    %cst_121 = arith.constant 3.200000e+01 : f32
    %283 = vector.broadcast %cst_121 : f32 to vector<16x1xf32>
    %284 = arith.divf %282, %283 : vector<16x1xf32>
    %285 = vector.broadcast %277 : vector<16x1xf32> to vector<16x32xf32>
    %286 = arith.subf %269, %285 : vector<16x32xf32>
    %cst_122 = arith.constant 9.99999996E-13 : f32
    %287 = vector.broadcast %cst_122 : f32 to vector<16x1xf32>
    %288 = arith.addf %284, %287 : vector<16x1xf32>
    %289 = math.rsqrt %288 : vector<16x1xf32>
    %290 = vector.broadcast %289 : vector<16x1xf32> to vector<16x32xf32>
    %291 = arith.mulf %286, %290 : vector<16x32xf32>
    %292 = vector.broadcast %271 : vector<1x32xf32> to vector<16x32xf32>
    %293 = arith.mulf %291, %292 : vector<16x32xf32>
    %294 = vector.broadcast %273 : vector<1x32xf32> to vector<16x32xf32>
    %295 = arith.addf %293, %294 : vector<16x32xf32>
    %296 = vector.extract_strided_slice %295 {offsets = [0, 0], sizes = [1, 32], strides = [1, 1]} : vector<16x32xf32> to vector<1x32xf32>
    %297 = vector.extract_strided_slice %295 {offsets = [8, 0], sizes = [1, 32], strides = [1, 1]} : vector<16x32xf32> to vector<1x32xf32>
    %298 = tpu.concatenate %296, %297 in 0 : vector<1x32xf32>, vector<1x32xf32> -> vector<2x32xf32>
    %c152 = arith.constant 152 : index
    %c0_123 = arith.constant 0 : index
    %299 = vector.load %arg4[%c152, %c0_123] : memref<248x128xf32, #tpu.memory_space<vmem>>, vector<32x32xf32>
    %cst_124 = arith.constant dense<0.000000e+00> : vector<2x32xf32>
    %300 = tpu.matmul %298, %299, %cst_124 {dimension_numbers = #tpu.dot_dimension_numbers<[1], [0], [0], [1], [0, 0, 1, 1], [], []>} : vector<2x32xf32>, vector<32x32xf32>, vector<2x32xf32> -> vector<2x32xf32>
    %c184 = arith.constant 184 : index
    %c0_125 = arith.constant 0 : index
    %301 = vector.load %arg4[%c184, %c0_125] : memref<248x128xf32, #tpu.memory_space<vmem>>, vector<1x32xf32>
    %302 = vector.broadcast %301 : vector<1x32xf32> to vector<2x32xf32>
    %303 = arith.addf %300, %302 : vector<2x32xf32>
    %304 = math.tanh %303 : vector<2x32xf32>
    %c192 = arith.constant 192 : index
    %c0_126 = arith.constant 0 : index
    %305 = vector.load %arg4[%c192, %c0_126] : memref<248x128xf32, #tpu.memory_space<vmem>>, vector<32x15xf32>
    %cst_127 = arith.constant dense<0.000000e+00> : vector<2x15xf32>
    %306 = tpu.matmul %304, %305, %cst_127 {dimension_numbers = #tpu.dot_dimension_numbers<[1], [0], [0], [1], [0, 0, 1, 1], [], []>} : vector<2x32xf32>, vector<32x15xf32>, vector<2x15xf32> -> vector<2x15xf32>
    %c224 = arith.constant 224 : index
    %c0_128 = arith.constant 0 : index
    %307 = vector.load %arg4[%c224, %c0_128] : memref<248x128xf32, #tpu.memory_space<vmem>>, vector<1x15xf32>
    %308 = vector.broadcast %307 : vector<1x15xf32> to vector<2x15xf32>
    %309 = arith.addf %306, %308 : vector<2x15xf32>
    %310 = vector.extract_strided_slice %309 {offsets = [0, 3], sizes = [2, 12], strides = [1, 1]} : vector<2x15xf32> to vector<2x12xf32>
    %311 = math.tanh %310 : vector<2x12xf32>
    %c232 = arith.constant 232 : index
    %c0_129 = arith.constant 0 : index
    %312 = vector.load %arg4[%c232, %c0_129] : memref<248x128xf32, #tpu.memory_space<vmem>>, vector<12x12xf32>
    %cst_130 = arith.constant dense<0.000000e+00> : vector<2x12xf32>
    %313 = tpu.matmul %311, %312, %cst_130 {dimension_numbers = #tpu.dot_dimension_numbers<[1], [0], [0], [1], [0, 0, 1, 1], [], []>} : vector<2x12xf32>, vector<12x12xf32>, vector<2x12xf32> -> vector<2x12xf32>
    %c244 = arith.constant 244 : index
    %c0_131 = arith.constant 0 : index
    %314 = vector.load %arg4[%c244, %c0_131] : memref<248x128xf32, #tpu.memory_space<vmem>>, vector<1x12xf32>
    %315 = vector.broadcast %314 : vector<1x12xf32> to vector<2x12xf32>
    %316 = arith.addf %313, %315 : vector<2x12xf32>
    %317 = vector.extract_strided_slice %309 {offsets = [0, 0], sizes = [2, 3], strides = [1, 1]} : vector<2x15xf32> to vector<2x3xf32>
    %c0_132 = arith.constant 0 : index
    %c0_133 = arith.constant 0 : index
    %318 = vector.load %arg5[%c0_132, %c0_133] : memref<2x3xf32, #tpu.memory_space<vmem>>, vector<2x3xf32>
    tpu.vector_store %arg5[%c0_132, %c0_133], %317 {strides = array<i32>} : memref<2x3xf32, #tpu.memory_space<vmem>>, vector<2x3xf32>,
    %c0_134 = arith.constant 0 : index
    %c0_135 = arith.constant 0 : index
    %319 = vector.load %arg6[%c0_134, %c0_135] : memref<2x12xf32, #tpu.memory_space<vmem>>, vector<2x12xf32>
    tpu.vector_store %arg6[%c0_134, %c0_135], %316 {strides = array<i32>} : memref<2x12xf32, #tpu.memory_space<vmem>>, vector<2x12xf32>,
    return
  }
}

</mosaic_0001>

<bundles_post_ra>
// kernel: adversarial_bert_forward.1
= control target key start
LH: loop header
LB: loop body
LE: loop exit
PB: predicated region body
PF: predicated region fallthrough
CT: control target
= control target key end

     0   :  { %12 = vsyncpa [#allocation3], 0  ;;  %s3781_s0 = inlined_call_operand.vmem [shape: s32[16,1], index: 0, kind: input, shape index: {}]   ;;  %s3782_s1 = inlined_call_operand.vmem [shape: f32[2,1,8], index: 1, kind: input, shape index: {}]   ;;  %s3783_s2 = inlined_call_operand.hbm [shape: bf16[2,192,128], index: 2, kind: input, shape index: {}]   ;;  %s3784_s3 = inlined_call_operand.vmem [shape: f32[2,8,128], index: 3, kind: input, shape index: {}]   ;;  %s3785_s4 = inlined_call_operand.hbm [shape: f32[248,128], index: 4, kind: input, shape index: {}]   ;;  %s3786_s5 = inlined_call_operand.hbm [shape: f32[2,3], index: 5, kind: output, shape index: {0}]   ;;  %s3787_s6 = inlined_call_operand.vmem [shape: f32[2,12], index: 6, kind: output, shape index: {1}]  }
   0x1   :  { %13 = vsyncpa [#allocation6], 0 }
   0x2   :  { %14 = vsyncpa [#allocation4], 0  ;;  %s3347_s21 = smov [#allocation2]   ;;  %s3275_s25 = scalar_lea.hbm %s3783_s2, 3072 }
   0x3   :  { %s24_s22 = sshll.u32 %s3347_s21, 4  ;;  %p3276_p0 = scmp.ne.s32.totalorder %s3783_s2, %s3275_s25  ;;  %s25_s22 = int_to_ptr.vmem [resolvable:$true] %s24_s22 }
   0x4   :  { %p3279_p1 = scmp.lt.u32.totalorder %s3275_s25, %s3783_s2 }
   0x6   :  { %p3281_p2 = pnand %p3279_p1, %p3276_p0 }
   0x8   :  { %3284 = shalt.err (!%p3281_p2)
}
   0x9   :  { %s3285_s30 = scalar_lea.vmem %s25_s22, 3072  ;;  %p3290_p4 = scmp.lt.s32.totalorder %s25_s22, %s25_s22 }
   0xa   :  { %p3286_p3 = scmp.ne.s32.totalorder %s25_s22, %s3285_s30  ;;  %p3291_p5 = scmp.lt.s32.totalorder %s3285_s30, %s3285_s30 }
   0xc   :  { %p3292_p6 = por %p3291_p5, %p3290_p4 }
   0xe   :  { %p3293_p7 = pnand %p3292_p6, %p3286_p3 }
  0x10   :  { %3296 = shalt.err (!%p3293_p7)
}
  0x11   :  { %s3348_s7 = smov 64   ;;  %s3349_s8 = smov 4  }
  0x12   :  { %30 = dma.hbm_to_vmem [thread:$0]  %s3783_s2, 3072, %s25_s22, [#allocation3], %s3348_s7, %s3348_s7, %s3349_s8  }
  0x13   :  { %s3350_s11 = smov [#allocation5]   ;;  %s3297_s15 = scalar_lea.hbm %s3785_s4, 3968 }
  0x14   :  { %s38_s12 = sshll.u32 %s3350_s11, 4  ;;  %p3298_p8 = scmp.ne.s32.totalorder %s3785_s4, %s3297_s15  ;;  %s39_s12 = int_to_ptr.vmem [resolvable:$true] %s38_s12 }
  0x15   :  { %p3301_p9 = scmp.lt.u32.totalorder %s3297_s15, %s3785_s4 }
  0x17   :  { %p3303_p10 = pnand %p3301_p9, %p3298_p8 }
  0x19   :  { %3306 = shalt.err (!%p3303_p10)
}
  0x1a   :  { %s3307_s20 = scalar_lea.vmem %s39_s12, 3968  ;;  %p3312_p12 = scmp.lt.s32.totalorder %s39_s12, %s39_s12 }
  0x1b   :  { %p3308_p11 = scmp.ne.s32.totalorder %s39_s12, %s3307_s20  ;;  %p3313_p13 = scmp.lt.s32.totalorder %s3307_s20, %s3307_s20 }
  0x1d   :  { %p3314_p0 = por %p3313_p13, %p3312_p12 }
  0x1f   :  { %p3315_p1 = pnand %p3314_p0, %p3308_p11 }
  0x21   :  { %3318 = shalt.err (!%p3315_p1)
}
  0x22   :  { %s3351_s2 = smov 128   ;;  %s3352_s21 = smov 8  }
  0x23   :  { %44 = dma.hbm_to_vmem [thread:$0]  %s3785_s4, 3968, %s39_s12, [#allocation6], %s3351_s2, %s3351_s2, %s3352_s21  }
  0x24   :  { %3341 = dma.done.wait [#allocation3], 3072  }
  0x25   :  { %3342 = vsyncadd [#allocation3], 4294964224 }
  0x26   :  { %3343 = dma.done.wait [#allocation6], 3968  }
  0x27   :  { %3344 = vsyncadd [#allocation6], 4294963328  ;;  %v3353_v0 = vmov 0   ;;  %v52_v1 = vld [vmem:[%s3781_s0] sm:$0xff]  ;;  %v69_v3 = vld [vmem:[#allocation5 + $0x8] sm:$0xff]  ;;  %v54_v27 = vlaneseq  ;;  %v3354_v30 = vmov 1.0  }
  0x28   :  { %3172 = vset.pattern.permute.xlu0 %v3353_v0  ;;  %v68_v2 = vld [vmem:[#allocation5] sm:$0xff]  ;;  %v70_v4 = vld [vmem:[#allocation5 + $0x10] sm:$0xff]  ;;  %v71_v5 = vld [vmem:[#allocation5 + $0x18] sm:$0xff]  ;;  %vm169_vm2 = vcmask 261120   ;;  %v3355_v53 = vmov 0.0   ;;  %vm3356_vm3 = vmmov 0  }
  0x29   :  { %57 = vperm.xlu0 %3172, %v52_v1   ;;  %v53_v6 = vld [vmem:[%s3781_s0 + $0x8] sm:$0xff]  ;;  %v3106_v7 = vpack.c.bf16 %v69_v3, %v68_v2  ;;  %v3110_v8 = vpack.c.bf16 %v71_v5, %v70_v4  ;;  %v72_v9 = vld [vmem:[#allocation5 + $0x20] sm:$0xff]  ;;  %v74_v11 = vld [vmem:[#allocation5 + $0x30] sm:$0xff]  ;;  %v55_v28 = vand.u32 127, %v54_v27  ;;  %2909 = vmatprep.subr.bf16.mxu1 %v3355_v53  ;;  %s3357_s28 = smov 112   ;;  %s3358_s29 = smov 96  }
  0x2a   :  { %v73_v10 = vld [vmem:[#allocation5 + $0x28] sm:$0xff]  ;;  %v75_v12 = vld [vmem:[#allocation5 + $0x38] sm:$0xff]  ;;  %v76_v14 = vld [vmem:[#allocation5 + $0x40] sm:$0xff]  ;;  %2913 = vmatprep.mubr.msk.bf16.mxu1 %vm3356_vm3, %v3355_v53  ;;  %vm301_vm4 = vcmask 130048   ;;  %vm604_vm5 = vcmask 64512   ;;  %s3360_s11 = smov 16  }
  0x2b   :  { %3107 = vmatprep.subr.bf16.mxu0 %v3106_v7  ;;  %v3114_v13 = vpack.c.bf16 %v73_v10, %v72_v9  ;;  %v77_v15 = vld [vmem:[#allocation5 + $0x48] sm:$0xff]  ;;  %v3118_v16 = vpack.c.bf16 %v75_v12, %v74_v11  ;;  %v78_v17 = vld [vmem:[#allocation5 + $0x50] sm:$0xff]  ;;  %v79_v18 = vld [vmem:[#allocation5 + $0x58] sm:$0xff]  ;;  %vm2400_vm6 = vcmask 1040384   ;;  %vm2581_vm7 = vcmask 1043456   ;;  %s3364_s14 = smov [#allocation7]  }
  0x2c   :  { %3109 = vmatpush3.bf16.msra.mxu0 %v3106_v7  ;;  %v3122_v19 = vpack.c.bf16 %v77_v15, %v76_v14  ;;  %v80_v20 = vld [vmem:[#allocation5 + $0x60] sm:$0xff]  ;;  %v81_v21 = vld [vmem:[#allocation5 + $0x68] sm:$0xff]  ;;  %v3126_v22 = vpack.c.bf16 %v79_v18, %v78_v17  ;;  %v82_v23 = vld [vmem:[#allocation5 + $0x70] sm:$0xff]  ;;  %vm3362_vm8 = vmmov 1   ;;  %vm2655_vm10 = vcmask 17408   ;;  %s2665_s15 = sshll.u32 %s3364_s14, 4  ;;  %s2666_s15 = int_to_ptr.vmem [resolvable:$true] %s2665_s15 }
  0x2d   :  { %60 = vperm.xlu0 %3172, %v53_v6   ;;  %3111 = vmatprep.subr.bf16.mxu0 %v3110_v8  ;;  %v83_v24 = vld [vmem:[#allocation5 + $0x78] sm:$0xff]  ;;  %v3130_v25 = vpack.c.bf16 %v81_v21, %v80_v20  ;;  %v84_v32 = vld [vmem:[#allocation5 + $0x80] sm:$0xff]  ;;  %v2683_v35 = vld [vmem:[#allocation5 + $0x90] ss:$0 sm:$0xff]  ;;  %vm2578_vm11 = vcmask 97280   ;;  %s3319_s16 = scalar_lea.vmem %s2666_s15, 32  ;;  %p3324_p3 = scmp.lt.s32.totalorder %s2666_s15, %s2666_s15 }
  0x2e   :  { %v3134_v26 = vpack.c.bf16 %v83_v24, %v82_v23  ;;  %v3183_v52 = vld [vmem:[#allocation2] sm:$0xff]   ;;  %v3184_v54 = vld [vmem:[#allocation2 + $0x8] sm:$0xff]   ;;  %v2684_v63 = vld [vmem:[#allocation5 + $0x91] ss:$0 sm:$0xff]  ;;  %p3320_p2 = scmp.ne.s32.totalorder %s2666_s15, %s3319_s16  ;;  %p3325_p4 = scmp.lt.s32.totalorder %s3319_s16, %s3319_s16 }
  0x2f   :  { %2910 = vmatpush3.bf16.msra.mxu1 %v3183_v52  ;;  %v2685_v3 = vld [vmem:[#allocation5 + $0x92] ss:$0 sm:$0xff]  ;;  %v209_v21 = vld [vmem:[%s3782_s1] sm:$0x1]  ;;  %v210_v24 = vld [vmem:[%s3782_s1 + $0x1] sm:$0x1] }
  0x30   :  { %3113 = vmatpush3.bf16.msra.mxu0 %v3110_v8  ;;  %2911 = vmatprep.subr.bf16.mxu1 %v3355_v53  ;;  %v2686_v8 = vld [vmem:[%s3784_s3] ss:$0 sm:$0xff]  ;;  %v211_v23 = vsub.f32 1.0, %v209_v21  ;;  %s3359_s1 = smov 32   ;;  %vm3152_vm9 = vmpackc.low %vm2581_vm7, %vm3362_vm8  ;;  %p3326_p5 = por %p3325_p4, %p3324_p3 }
  0x31   :  { %3115 = vmatprep.subr.bf16.mxu0 %v3114_v13 }
  0x32   :  { %p3327_p6 = pnand %p3326_p5, %p3320_p2 }
  0x33   :  { %2912 = vmatpush3.bf16.msra.mxu1 %v3184_v54 }
  0x34   :  { %3117 = vmatpush3.bf16.msra.mxu0 %v3114_v13  ;;  %2917 = vmatprep.subr.mxu1 %v3355_v53 }
  0x35   :  { %3119 = vmatprep.subr.bf16.mxu0 %v3118_v16 }
  0x38   :  { %3121 = vmatpush3.bf16.msra.mxu0 %v3118_v16 }
  0x39   :  { %3123 = vmatprep.subr.bf16.mxu0 %v3122_v19 }
  0x3c   :  { %3125 = vmatpush3.bf16.msra.mxu0 %v3122_v19 }
  0x3d   :  { %3127 = vmatprep.subr.bf16.mxu0 %v3126_v22 }
  0x40   :  { %3129 = vmatpush3.bf16.msra.mxu0 %v3126_v22  ;;  %v290_v22 = vshrl.u32 %v54_v27, 7 }
  0x41   :  { %3131 = vmatprep.subr.bf16.mxu0 %v3130_v25 }
  0x44   :  { %3133 = vmatpush3.bf16.msra.mxu0 %v3130_v25  ;;  %v291_v25 = vsub.s32 0, %v290_v22  ;;  %v3185_v22 = vld [vmem:[#allocation2] sm:$0xff]  }
  0x45   :  { %3135 = vmatprep.subr.bf16.mxu0 %v3134_v26 }
  0x48   :  { %3137 = vmatpush3.bf16.msra.mxu0 %v3134_v26  ;;  %v213_v26 = vmul.f32 -10000.0, %v211_v23  ;;  %v3186_v23 = vld [vmem:[#allocation2 + $0x8] sm:$0xff]  }
  0x49   :  { %2942 = vmatprep.subr.mxu0 %v3355_v53 }
  0xa8   :  { %v58_v29 = vpop.permute.xlu0 %57 }
  0xa9   :  { %vm62_vm0 = vcmp.eq.s32.totalorder %v55_v28, %v58_v29  ;;  %v3508_v29 = vrot.slane %v213_v26, %v291_v25 }
  0xaa   :  { %2906 = vmatprep.mubr.msk.f32.mxu0 %vm62_vm0, %v3354_v30 }
  0xac   :  { %v61_v31 = vpop.permute.xlu0 %60 }
  0xad   :  { %vm63_vm1 = vcmp.eq.s32.totalorder %v55_v28, %v61_v31  ;;  %v212_v28 = vsub.f32 1.0, %v210_v24 }
  0xae   :  { %2907 = vmatmul.mubr.msk.f32.vlgmr.msra.gmra.mrb[0].mxu0 %vm63_vm1, %v3354_v30 }
  0xaf   :  { %2944 = vmatprep.mubr.msk.f32.mxu0 %vm3356_vm3, %v3355_v53  ;;  %v214_v30 = vmul.f32 -10000.0, %v212_v28 }
 0x181   :  { %v2908_v33 = vpop.f32.mrb[0].mxu0 }
 0x182   :  { %v151_v34 = vpop.f32.mrb[1].mxu0  ;;  %v157_v36 = vadd.f32 %v2908_v33, %v84_v32 }
 0x183   :  { %v152_v37 = vadd.f32 %v151_v34, %v84_v32  ;;  %v3511_v34 = vrot.slane %v214_v30, %v291_v25 }
 0x184   :  { %v166_v40 = vadd.f32 %v2683_v35, %v157_v36 }
 0x185   :  { %v165_v38 = vadd.f32 %v2683_v35, %v152_v37 }
 0x186   :  { %v173_v41 = vsel %vm169_vm2, %v166_v40, 0.0 }
 0x187   :  { %v170_v39 = vsel %vm169_vm2, %v165_v38, 0.0 }
 0x188   :  { %171 = vadd.xlane.f32.xlu1 %v170_v39 }
 0x18c   :  { %174 = vadd.xlane.f32.xlu1 %v173_v41 }
 0x215   :  { %v172_v42 = vpop.xlane.xlu1 %171 }
 0x216   :  { %v177_v43 = vmul.f32 0.03125, %v172_v42 }
 0x218   :  { %v179_v44 = vsub.f32 %v165_v38, %v177_v43 }
 0x219   :  { %v175_v45 = vpop.xlane.xlu1 %174 }
 0x21a   :  { %v178_v46 = vmul.f32 0.03125, %v175_v45  ;;  %v181_v47 = vmul.f32 %v179_v44, %v179_v44 }
 0x21c   :  { %v180_v48 = vsub.f32 %v166_v40, %v178_v46  ;;  %v183_v49 = vsel %vm169_vm2, %v181_v47, 0.0 }
 0x21d   :  { %184 = vadd.xlane.f32.xlu0 %v183_v49 }
 0x21e   :  { %v182_v50 = vmul.f32 %v180_v48, %v180_v48 }
 0x220   :  { %v186_v51 = vsel %vm169_vm2, %v182_v50, 0.0 }
 0x221   :  { %187 = vadd.xlane.f32.xlu1 %v186_v51 }
 0x2aa   :  { %v185_v55 = vpop.xlane.xlu0 %184 }
 0x2ab   :  { %v189_v56 = vmul.f32 0.03125, %v185_v55 }
 0x2ad   :  { %v191_v57 = vadd.f32 1e-12, %v189_v56 }
 0x2ae   :  { %v188_v58 = vpop.xlane.xlu1 %187 }
 0x2af   :  { %3211 = vrsqrt.f32 %v191_v57  ;;  %v190_v59 = vmul.f32 0.03125, %v188_v58 }
 0x2b1   :  { %v192_v60 = vadd.f32 1e-12, %v190_v59 }
 0x2b3   :  { %3213 = vrsqrt.f32 %v192_v60 }
 0x2b9   :  { %v3212_v61 = vpop.eup %3211 }
 0x2ba   :  { %v195_v62 = vmul.f32 %v3212_v61, %v179_v44 }
 0x2bc   :  { %v201_v2 = vmul.f32 %v2684_v63, %v195_v62 }
 0x2bd   :  { %v3214_v0 = vpop.eup %3213 }
 0x2be   :  { %v196_v1 = vmul.f32 %v3214_v0, %v180_v48  ;;  %v3445_v5 = vadd.f32 %v2685_v3, %v201_v2 }
 0x2c0   :  { %v202_v4 = vmul.f32 %v2684_v63, %v196_v1 }
 0x2c2   :  { %v3447_v6 = vadd.f32 %v2685_v3, %v202_v4 }
 0x2c4   :  { %v215_v7 = vpack.c.bf16 %v3447_v6, %v3445_v5 }
 0x2c6   :  { %2914 = vmatmul.mubr.msk.bf16.vlgmr.msra.gmra.mrb[0].mxu1 %vm169_vm2, %v215_v7 }
 0x2c7   :  { %2919 = vmatprep.mubr.msk.f32.mxu1 %vm3356_vm3, %v3355_v53 }
 0x399   :  { %v274_v9 = vpop.f32.mrb[0].mxu1 }
 0x39a   :  { %v3457_v10 = vadd.f32 %v2686_v8, %v274_v9  ;;  %v2915_v11 = vpop.f32.mrb[1].mxu1 }
 0x39b   :  { %v277_v12 = vpop.f32.mrb[2].mxu1 }
 0x39c   :  { %283 = vrot.lane.b32.xlu1 %v3457_v10, %s3357_s28  ;;  %v2916_v13 = vpop.f32.mrb[3].mxu1  ;;  %v3461_v14 = vadd.f32 %v2686_v8, %v277_v12 }
 0x3a0   :  { %285 = vrot.lane.b32.xlu1 %v3461_v14, %s3357_s28 }
 0x3a4   :  { %299 = vrot.lane.b32.xlu1 %v3457_v10, %s3358_s29 }
 0x3a8   :  { %376 = vrot.lane.b32.xlu1 %v3461_v14, %s3358_s29 }
 0x40e   :  { %v3469_v15 = vpop.permute.xlu1 %283 }
 0x40f   :  { %452 = vrot.lane.b32.xlu0 %v3469_v15, %s3358_s29 }
 0x412   :  { %v3473_v16 = vpop.permute.xlu1 %285 }
 0x413   :  { %528 = vrot.lane.b32.xlu1 %v3473_v16, %s3358_s29 }
 0x416   :  { %v300_v17 = vpop.permute.xlu1 %299 }
 0x417   :  { %2918 = vmatpush3.xpose.msk.msra.mxu1 %vm301_vm4, %v300_v17 }
 0x418   :  { %2922 = vmatprep.subr.mxu1 %v3355_v53 }
 0x41a   :  { %2920 = vmatmul.mubr.msk.f32.vlgmr.msra.gmra.mrb[4].mxu1 %vm301_vm4, %v3457_v10  ;;  %v377_v18 = vpop.permute.xlu1 %376 }
 0x41b   :  { %2923 = vmatpush3.xpose.msk.msra.mxu1 %vm301_vm4, %v377_v18  ;;  %2924 = vmatprep.mubr.msk.f32.mxu1 %vm3356_vm3, %v3355_v53 }
 0x41c   :  { %2927 = vmatprep.subr.mxu1 %v3355_v53 }
 0x41e   :  { %2925 = vmatmul.mubr.msk.f32.vlgmr.msra.gmra.mrb[6].mxu1 %vm301_vm4, %v3461_v14 }
 0x41f   :  { %2929 = vmatprep.mubr.msk.f32.mxu1 %vm3356_vm3, %v3355_v53 }
 0x481   :  { %v453_v19 = vpop.permute.xlu0 %452 }
 0x482   :  { %2928 = vmatpush3.xpose.msk.msra.mxu1 %vm301_vm4, %v453_v19 }
 0x483   :  { %2932 = vmatprep.subr.mxu1 %v3355_v53 }
 0x485   :  { %2930 = vmatmul.mubr.msk.f32.vlgmr.msra.gmra.mrb[8].mxu1 %vm301_vm4, %v3469_v15  ;;  %v529_v20 = vpop.permute.xlu1 %528 }
 0x486   :  { %2933 = vmatpush3.xpose.msk.msra.mxu1 %vm301_vm4, %v529_v20  ;;  %2934 = vmatprep.mubr.msk.f32.mxu1 %vm3356_vm3, %v3355_v53 }
 0x487   :  { %2937 = vmatprep.subr.mxu1 %v3355_v53 }
 0x489   :  { %2935 = vmatmul.mubr.msk.f32.vlgmr.msra.gmra.mrb[10].mxu1 %vm301_vm4, %v3473_v16 }
 0x48a   :  { %2939 = vmatprep.mubr.msk.f32.mxu1 %vm3356_vm3, %v3355_v53 }
 0x4ed   :  { %v372_v31 = vpop.f32.mrb[4].mxu1 }
 0x4ee   :  { %v373_v32 = vadd.f32 %v372_v31, %v3508_v29  ;;  %v2921_v33 = vpop.f32.mrb[5].mxu1 }
 0x4f0   :  { %v605_v27 = vsel %vm604_vm5, %v373_v32, -inf }
 0x4f1   :  { %606 = vmax.xlane.f32.xlu1 %v605_v27  ;;  %v448_v35 = vpop.f32.mrb[6].mxu1 }
 0x4f2   :  { %v449_v36 = vadd.f32 %v448_v35, %v3511_v34  ;;  %v2926_v37 = vpop.f32.mrb[7].mxu1 }
 0x4f4   :  { %v608_v38 = vsel %vm604_vm5, %v449_v36, -inf }
 0x4f5   :  { %609 = vmax.xlane.f32.xlu0 %v608_v38 }
 0x558   :  { %v524_v39 = vpop.f32.mrb[8].mxu1 }
 0x559   :  { %v525_v40 = vadd.f32 %v524_v39, %v3508_v29  ;;  %v2931_v41 = vpop.f32.mrb[9].mxu1 }
 0x55b   :  { %v611_v42 = vsel %vm604_vm5, %v525_v40, -inf }
 0x55c   :  { %612 = vmax.xlane.f32.xlu1 %v611_v42  ;;  %v600_v43 = vpop.f32.mrb[10].mxu1 }
 0x55d   :  { %v601_v44 = vadd.f32 %v600_v43, %v3511_v34  ;;  %v2936_v45 = vpop.f32.mrb[11].mxu1  ;;  %v2702_v43 = vld [vmem:[%s3784_s3 + $0x1] ss:$0 sm:$0xff] }
 0x55f   :  { %v614_v46 = vsel %vm604_vm5, %v601_v44, -inf }
 0x560   :  { %615 = vmax.xlane.f32.xlu1 %v614_v46 }
 0x571   :  { %649 = vrot.lane.b32.xlu1 %v3457_v10, %s3348_s7 }
 0x57e   :  { %v607_v47 = vpop.xlane.xlu1 %606 }
 0x57f   :  { %v617_v48 = vsub.f32 %v373_v32, %v607_v47 }
 0x581   :  { %v621_v49 = vmul.f32 1.442695, %v617_v48 }
 0x582   :  { %v610_v50 = vpop.xlane.xlu0 %609 }
 0x583   :  { %v618_v51 = vsub.f32 %v449_v36, %v610_v50  ;;  %3215 = vpow2.f32 %v621_v49 }
 0x585   :  { %v623_v52 = vmul.f32 1.442695, %v618_v51 }
 0x587   :  { %3217 = vpow2.f32 %v623_v52 }
 0x58d   :  { %v3216_v54 = vpop.eup %3215 }
 0x58e   :  { %v629_v57 = vsel %vm604_vm5, %v3216_v54, 0.0 }
 0x591   :  { %v3218_v55 = vpop.eup %3217 }
 0x592   :  { %v632_v56 = vsel %vm604_vm5, %v3218_v55, 0.0 }
 0x593   :  { %633 = vadd.xlane.f32.xlu0 %v632_v56 }
 0x595   :  { %630 = vadd.xlane.f32.xlu1 %v629_v57 }
 0x5e9   :  { %v613_v58 = vpop.xlane.xlu1 %612 }
 0x5ea   :  { %v619_v59 = vsub.f32 %v525_v40, %v613_v58 }
 0x5ec   :  { %v625_v60 = vmul.f32 1.442695, %v619_v59 }
 0x5ed   :  { %v616_v61 = vpop.xlane.xlu1 %615 }
 0x5ee   :  { %3219 = vpow2.f32 %v625_v60  ;;  %v620_v62 = vsub.f32 %v601_v44, %v616_v61 }
 0x5f0   :  { %v627_v63 = vmul.f32 1.442695, %v620_v62 }
 0x5f1   :  { %v650_v0 = vpop.permute.xlu1 %649 }
 0x5f2   :  { %3221 = vpow2.f32 %v627_v63  ;;  %2938 = vmatpush3.msra.mxu1 %v650_v0  ;;  %v3187_v0 = vld [vmem:[#allocation2 + $0x10] sm:$0xff]  }
 0x5f3   :  { %2947 = vmatprep.subr.mxu1 %v3355_v53 }
 0x5f8   :  { %v3220_v1 = vpop.eup %3219 }
 0x5f9   :  { %v635_v2 = vsel %vm604_vm5, %v3220_v1, 0.0 }
 0x5fa   :  { %636 = vadd.xlane.f32.xlu1 %v635_v2 }
 0x5fc   :  { %v3222_v3 = vpop.eup %3221 }
 0x5fd   :  { %v638_v4 = vsel %vm604_vm5, %v3222_v3, 0.0 }
 0x5fe   :  { %639 = vadd.xlane.f32.xlu0 %v638_v4 }
 0x60b   :  { %801 = vrot.lane.b32.xlu1 %v3469_v15, %s3348_s7 }
 0x60f   :  { %877 = vrot.lane.b32.xlu1 %v3473_v16, %s3348_s7 }
 0x614   :  { %725 = vrot.lane.b32.xlu0 %v3461_v14, %s3348_s7 }
 0x618   :  { %983 = vrot.lane.b32.xlu0 %v3185_v22, %s3359_s1  ;;  %v3191_v22 = vld [vmem:[#allocation2 + $0x30] sm:$0xff]  }
 0x61c   :  { %985 = vrot.lane.b32.xlu0 %v3186_v23, %s3359_s1  ;;  %v3192_v23 = vld [vmem:[#allocation2 + $0x38] sm:$0xff]  }
 0x620   :  { %v634_v10 = vpop.xlane.xlu0 %633 }
 0x622   :  { %v631_v7 = vpop.xlane.xlu1 %630 }
 0x623   :  { %3223 = vrcp.f32 %v631_v7 }
 0x624   :  { %3225 = vrcp.f32 %v634_v10  ;;  %v2706_v10 = vld [vmem:[%s3784_s3 + $0x2] ss:$0 sm:$0xff] }
 0x62d   :  { %v3224_v8 = vpop.eup %3223 }
 0x62e   :  { %v642_v9 = vmul.f32 %v3224_v8, %v3216_v54  ;;  %v3226_v15 = vpop.eup %3225 }
 0x62f   :  { %v644_v14 = vmul.f32 %v3226_v15, %v3218_v55 }
 0x630   :  { %2940 = vmatmul.mubr.msk.f32.vlgmr.msra.gmra.mrb[12].mxu1 %vm604_vm5, %v642_v9 }
 0x631   :  { %2949 = vmatprep.mubr.msk.f32.mxu1 %vm3356_vm3, %v3355_v53 }
 0x687   :  { %v637_v11 = vpop.xlane.xlu1 %636 }
 0x688   :  { %3227 = vrcp.f32 %v637_v11 }
 0x68b   :  { %v640_v12 = vpop.xlane.xlu0 %639  ;;  %v802_v13 = vpop.permute.xlu1 %801 }
 0x68c   :  { %3229 = vrcp.f32 %v640_v12  ;;  %2948 = vmatpush3.msra.mxu1 %v802_v13 }
 0x68d   :  { %2957 = vmatprep.subr.bf16.mxu1 %v3355_v53 }
 0x68f   :  { %v726_v16 = vpop.permute.xlu0 %725  ;;  %v878_v17 = vpop.permute.xlu1 %877 }
 0x690   :  { %2943 = vmatpush3.msra.mxu0 %v726_v16 }
 0x691   :  { %2945 = vmatmul.mubr.msk.f32.vlgmr.msra.gmra.mrb[2].mxu0 %vm604_vm5, %v644_v14  ;;  %2952 = vmatprep.subr.mxu0 %v3355_v53  ;;  %v2707_v14 = vld [vmem:[%s3784_s3 + $0x3] ss:$0 sm:$0xff] }
 0x692   :  { %v3228_v18 = vpop.eup %3227  ;;  %2953 = vmatpush3.msra.mxu0 %v878_v17  ;;  %2954 = vmatprep.mubr.msk.f32.mxu0 %vm3356_vm3, %v3355_v53 }
 0x693   :  { %v646_v19 = vmul.f32 %v3228_v18, %v3220_v1  ;;  %2965 = vmatprep.subr.bf16.mxu0 %v3355_v53  ;;  %v984_v26 = vpop.permute.xlu0 %983 }
 0x695   :  { %2950 = vmatmul.mubr.msk.f32.vlgmr.msra.gmra.mrb[14].mxu1 %vm604_vm5, %v646_v19 }
 0x696   :  { %v3230_v20 = vpop.eup %3229  ;;  %2961 = vmatprep.mubr.msk.bf16.mxu1 %vm3356_vm3, %v3355_v53  ;;  %2958 = vmatpush3.bf16.msra.mxu1 %v984_v26  ;;  %v3195_v26 = vld [vmem:[#allocation2 + $0x50] sm:$0xff]  }
 0x697   :  { %v648_v21 = vmul.f32 %v3230_v20, %v3222_v3  ;;  %2959 = vmatprep.subr.bf16.mxu1 %v3355_v53  ;;  %v986_v28 = vpop.permute.xlu0 %985  ;;  %v3189_v20 = vld [vmem:[#allocation2 + $0x20] sm:$0xff]  }
 0x699   :  { %2955 = vmatmul.mubr.msk.f32.vlgmr.msra.gmra.mrb[4].mxu0 %vm604_vm5, %v648_v21  ;;  %v3190_v21 = vld [vmem:[#allocation2 + $0x28] sm:$0xff]  }
 0x69a   :  { %2969 = vmatprep.mubr.msk.bf16.mxu0 %vm3356_vm3, %v3355_v53  ;;  %2960 = vmatpush3.bf16.msra.mxu1 %v986_v28  ;;  %v3196_v28 = vld [vmem:[#allocation2 + $0x58] sm:$0xff]  }
 0x69b   :  { %2973 = vmatprep.subr.bf16.mxu1 %v3355_v53  ;;  %2966 = vmatpush3.bf16.msra.mxu0 %v3187_v0 }
 0x69c   :  { %2967 = vmatprep.subr.bf16.mxu0 %v3355_v53 }
 0x703   :  { %v721_v24 = vpop.f32.mrb[12].mxu1 }
 0x704   :  { %v2941_v25 = vpop.f32.mrb[13].mxu1 }
 0x705   :  { %v3194_v25 = vld [vmem:[#allocation2 + $0x48] sm:$0xff]  }
 0x764   :  { %v797_v30 = vpop.f32.mrb[2].mxu0 }
 0x765   :  { %v2946_v31 = vpop.f32.mrb[3].mxu0 }
 0x768   :  { %v873_v32 = vpop.f32.mrb[14].mxu1 }
 0x769   :  { %v2951_v33 = vpop.f32.mrb[15].mxu1 }
 0x76c   :  { %v949_v27 = vpop.f32.mrb[4].mxu0 }
 0x76d   :  { %v3173_v35 = vpack.i.bf16 %v949_v27, %v873_v32  ;;  %v2956_v36 = vpop.f32.mrb[5].mxu0 }
 0x76f   :  { %3174 = vrot.lane.b32.xlu1 %v3173_v35, %s3360_s11 }
 0x7e1   :  { %v3175_v37 = vpop.permute.xlu1 %3174 }
 0x7e2   :  { %v3177_v38 = vunpack.i.h.bf16 %v3175_v37  ;;  %v3176_v39 = vunpack.i.l.bf16 %v3175_v37 }
 0x7e4   :  { %v962_v40 = vsel %vm301_vm4, %v797_v30, %v3177_v38  ;;  %v961_v41 = vsel %vm301_vm4, %v721_v24, %v3176_v39  ;;  %v3193_v24 = vld [vmem:[#allocation2 + $0x40] sm:$0xff]  }
 0x7e5   :  { %v963_v42 = vpack.c.bf16 %v962_v40, %v961_v41  ;;  %v2708_v30 = vld [vmem:[%s3784_s3 + $0x4] ss:$0 sm:$0xff] }
 0x7e7   :  { %2962 = vmatmul.mubr.msk.bf16.vlgmr.msra.gmra.mrb[16].mxu1 %vm169_vm2, %v963_v42 }
 0x7e8   :  { %2989 = vmatprep.mubr.msk.bf16.mxu1 %vm3356_vm3, %v3355_v53  ;;  %2974 = vmatpush3.bf16.msra.mxu1 %v3189_v20 }
 0x7e9   :  { %2975 = vmatprep.subr.bf16.mxu1 %v3355_v53 }
 0x7ec   :  { %2976 = vmatpush3.bf16.msra.mxu1 %v3190_v21 }
 0x7ed   :  { %2977 = vmatprep.subr.bf16.mxu1 %v3355_v53 }
 0x7f0   :  { %2978 = vmatpush3.bf16.msra.mxu1 %v3191_v22 }
 0x7f1   :  { %2979 = vmatprep.subr.bf16.mxu1 %v3355_v53 }
 0x7f4   :  { %2980 = vmatpush3.bf16.msra.mxu1 %v3192_v23  ;;  %v2721_v23 = vld [vmem:[%s3784_s3 + $0x6] ss:$0 sm:$0xff] }
 0x7f5   :  { %2981 = vmatprep.subr.bf16.mxu1 %v3355_v53 }
 0x7f8   :  { %2982 = vmatpush3.bf16.msra.mxu1 %v3193_v24 }
 0x7f9   :  { %2983 = vmatprep.subr.bf16.mxu1 %v3355_v53 }
 0x7fc   :  { %2984 = vmatpush3.bf16.msra.mxu1 %v3194_v25 }
 0x7fd   :  { %2985 = vmatprep.subr.bf16.mxu1 %v3355_v53 }
 0x800   :  { %2986 = vmatpush3.bf16.msra.mxu1 %v3195_v26 }
 0x801   :  { %2987 = vmatprep.subr.bf16.mxu1 %v3355_v53 }
 0x804   :  { %2988 = vmatpush3.bf16.msra.mxu1 %v3196_v28 }
 0x805   :  { %3041 = vmatprep.subr.bf16.mxu1 %v3355_v53 }
 0x8ba   :  { %v1026_v44 = vpop.f32.mrb[16].mxu1 }
 0x8bb   :  { %v1027_v45 = vadd.f32 %v2702_v43, %v1026_v44  ;;  %v2963_v46 = vpop.f32.mrb[17].mxu1 }
 0x8bc   :  { %v1029_v47 = vpop.f32.mrb[18].mxu1 }
 0x8bd   :  { %v1030_v48 = vadd.f32 %v2702_v43, %v1029_v47  ;;  %v2964_v49 = vpop.f32.mrb[19].mxu1  ;;  %v1033_v50 = vadd.f32 %v1027_v45, %v3445_v5 }
 0x8bf   :  { %v1037_v51 = vsel %vm169_vm2, %v1033_v50, 0.0  ;;  %v1034_v52 = vadd.f32 %v1030_v48, %v3447_v6  ;;  %v3188_v6 = vld [vmem:[#allocation2 + $0x18] sm:$0xff]  }
 0x8c0   :  { %1038 = vadd.xlane.f32.xlu1 %v1037_v51  ;;  %2968 = vmatpush3.bf16.msra.mxu0 %v3188_v6 }
 0x8c1   :  { %v1040_v54 = vsel %vm169_vm2, %v1034_v52, 0.0  ;;  %2993 = vmatprep.subr.bf16.mxu0 %v3355_v53 }
 0x8c2   :  { %1041 = vadd.xlane.f32.xlu0 %v1040_v54 }
 0x94d   :  { %v1039_v55 = vpop.xlane.xlu1 %1038 }
 0x94e   :  { %v1043_v56 = vmul.f32 0.03125, %v1039_v55 }
 0x94f   :  { %v1042_v57 = vpop.xlane.xlu0 %1041 }
 0x950   :  { %v1045_v58 = vsub.f32 %v1033_v50, %v1043_v56  ;;  %v1044_v59 = vmul.f32 0.03125, %v1042_v57  ;;  %v2712_v57 = vld [vmem:[%s3784_s3 + $0x5] ss:$0 sm:$0xff] }
 0x952   :  { %v1046_v60 = vsub.f32 %v1034_v52, %v1044_v59  ;;  %v1047_v61 = vmul.f32 %v1045_v58, %v1045_v58 }
 0x954   :  { %v1049_v62 = vsel %vm169_vm2, %v1047_v61, 0.0  ;;  %v1048_v63 = vmul.f32 %v1046_v60, %v1046_v60 }
 0x955   :  { %1050 = vadd.xlane.f32.xlu0 %v1049_v62 }
 0x956   :  { %v1052_v5 = vsel %vm169_vm2, %v1048_v63, 0.0 }
 0x957   :  { %1053 = vadd.xlane.f32.xlu1 %v1052_v5 }
 0x9e2   :  { %v1051_v1 = vpop.xlane.xlu0 %1050 }
 0x9e3   :  { %v1055_v2 = vmul.f32 0.03125, %v1051_v1 }
 0x9e4   :  { %v1054_v3 = vpop.xlane.xlu1 %1053 }
 0x9e5   :  { %v1057_v4 = vadd.f32 1e-12, %v1055_v2  ;;  %v1056_v7 = vmul.f32 0.03125, %v1054_v3 }
 0x9e7   :  { %3231 = vrsqrt.f32 %v1057_v4  ;;  %v1058_v8 = vadd.f32 1e-12, %v1056_v7 }
 0x9e9   :  { %3233 = vrsqrt.f32 %v1058_v8 }
 0x9f1   :  { %v3232_v9 = vpop.eup %3231 }
 0x9f2   :  { %v1061_v11 = vmul.f32 %v3232_v9, %v1045_v58 }
 0x9f3   :  { %v3234_v12 = vpop.eup %3233 }
 0x9f4   :  { %v1067_v13 = vmul.f32 %v2706_v10, %v1061_v11  ;;  %v1062_v15 = vmul.f32 %v3234_v12, %v1046_v60 }
 0x9f6   :  { %v1068_v16 = vmul.f32 %v2706_v10, %v1062_v15  ;;  %v3575_v17 = vadd.f32 %v2707_v14, %v1067_v13  ;;  %v3197_v15 = vld [vmem:[#allocation2 + $0x60] sm:$0xff]  }
 0x9f8   :  { %v3577_v18 = vadd.f32 %v2707_v14, %v1068_v16  ;;  %v3198_v14 = vld [vmem:[#allocation2 + $0x68] sm:$0xff]  }
 0x9fa   :  { %v1075_v19 = vpack.c.bf16 %v3577_v18, %v3575_v17 }
 0x9fc   :  { %2970 = vmatmul.mubr.msk.bf16.vlgmr.msra.gmra.mrb[8].mxu0 %vm169_vm2, %v1075_v19 }
 0x9fd   :  { %2997 = vmatprep.mubr.msk.bf16.mxu0 %vm3356_vm3, %v3355_v53  ;;  %2994 = vmatpush3.bf16.msra.mxu0 %v3197_v15 }
 0x9fe   :  { %2995 = vmatprep.subr.bf16.mxu0 %v3355_v53 }
 0xa01   :  { %2996 = vmatpush3.bf16.msra.mxu0 %v3198_v14 }
 0xa02   :  { %3001 = vmatprep.subr.mxu0 %v3355_v53 }
 0xacf   :  { %v1134_v31 = vpop.f32.mrb[8].mxu0 }
 0xad0   :  { %v1135_v32 = vadd.f32 %v2708_v30, %v1134_v31  ;;  %v2971_v33 = vpop.f32.mrb[9].mxu0 }
 0xad1   :  { %v1137_v27 = vpop.f32.mrb[10].mxu0 }
 0xad2   :  { %v1143_v35 = vmul.f32 0.044715, %v1135_v32  ;;  %v1138_v36 = vadd.f32 %v2708_v30, %v1137_v27  ;;  %v2972_v37 = vpop.f32.mrb[11].mxu0  ;;  %v1141_v50 = vmul.f32 0.5, %v1135_v32  ;;  %v2722_v30 = vld [vmem:[%s3784_s3 + $0x7] ss:$0 sm:$0xff] }
 0xad4   :  { %v1145_v38 = vmul.f32 %v1143_v35, %v1135_v32  ;;  %v1144_v39 = vmul.f32 0.044715, %v1138_v36  ;;  %v1142_v51 = vmul.f32 0.5, %v1138_v36  ;;  %v2724_v35 = vld [vmem:[%s3784_s3 + $0x8] ss:$0 sm:$0xff] }
 0xad6   :  { %v1147_v40 = vmul.f32 %v1145_v38, %v1135_v32  ;;  %v1146_v41 = vmul.f32 %v1144_v39, %v1138_v36 }
 0xad8   :  { %v1149_v42 = vadd.f32 %v1147_v40, %v1135_v32  ;;  %v1148_v43 = vmul.f32 %v1146_v41, %v1138_v36 }
 0xada   :  { %v1151_v44 = vmul.f32 0.7978846, %v1149_v42  ;;  %v1150_v45 = vadd.f32 %v1148_v43, %v1138_v36 }
 0xadc   :  { %3235 = vtanh.f32 %v1151_v44  ;;  %v1152_v46 = vmul.f32 0.7978846, %v1150_v45 }
 0xade   :  { %3237 = vtanh.f32 %v1152_v46 }
 0xae6   :  { %v3236_v47 = vpop.eup %3235 }
 0xae7   :  { %v1155_v48 = vadd.f32 1.0, %v3236_v47 }
 0xae8   :  { %v3238_v49 = vpop.eup %3237 }
 0xae9   :  { %v1156_v52 = vadd.f32 1.0, %v3238_v49  ;;  %v1157_v54 = vmul.f32 %v1155_v48, %v1141_v50 }
 0xaeb   :  { %v1158_v55 = vmul.f32 %v1156_v52, %v1142_v51 }
 0xaed   :  { %v1159_v56 = vpack.c.bf16 %v1158_v55, %v1157_v54 }
 0xaef   :  { %2990 = vmatmul.mubr.bf16.vlgmr.msra.gmra.mrb[20].mxu1 %v1159_v56 }
 0xaf0   :  { %3045 = vmatprep.mubr.msk.bf16.mxu1 %vm3356_vm3, %v3355_v53 }
 0xbc2   :  { %v1263_v58 = vpop.f32.mrb[20].mxu1 }
 0xbc3   :  { %v1264_v59 = vadd.f32 %v2712_v57, %v1263_v58  ;;  %v2991_v60 = vpop.f32.mrb[21].mxu1 }
 0xbc4   :  { %v1266_v61 = vpop.f32.mrb[22].mxu1 }
 0xbc5   :  { %v1267_v62 = vadd.f32 %v2712_v57, %v1266_v61  ;;  %v2992_v63 = vpop.f32.mrb[23].mxu1  ;;  %v1270_v5 = vadd.f32 %v1264_v59, %v3575_v17 }
 0xbc7   :  { %v1274_v0 = vsel %vm169_vm2, %v1270_v5, 0.0  ;;  %v1271_v6 = vadd.f32 %v1267_v62, %v3577_v18 }
 0xbc8   :  { %1275 = vadd.xlane.f32.xlu0 %v1274_v0 }
 0xbc9   :  { %v1277_v1 = vsel %vm169_vm2, %v1271_v6, 0.0 }
 0xbca   :  { %1278 = vadd.xlane.f32.xlu1 %v1277_v1 }
 0xc55   :  { %v1276_v2 = vpop.xlane.xlu0 %1275 }
 0xc56   :  { %v1280_v3 = vmul.f32 0.03125, %v1276_v2 }
 0xc57   :  { %v1279_v4 = vpop.xlane.xlu1 %1278 }
 0xc58   :  { %v1282_v7 = vsub.f32 %v1270_v5, %v1280_v3  ;;  %v1281_v8 = vmul.f32 0.03125, %v1279_v4 }
 0xc5a   :  { %v1283_v9 = vsub.f32 %v1271_v6, %v1281_v8  ;;  %v1284_v10 = vmul.f32 %v1282_v7, %v1282_v7 }
 0xc5c   :  { %v1286_v11 = vsel %vm169_vm2, %v1284_v10, 0.0  ;;  %v1285_v12 = vmul.f32 %v1283_v9, %v1283_v9 }
 0xc5d   :  { %1287 = vadd.xlane.f32.xlu0 %v1286_v11 }
 0xc5e   :  { %v1289_v13 = vsel %vm169_vm2, %v1285_v12, 0.0 }
 0xc5f   :  { %1290 = vadd.xlane.f32.xlu1 %v1289_v13 }
 0xcea   :  { %v1288_v16 = vpop.xlane.xlu0 %1287 }
 0xceb   :  { %v1292_v17 = vmul.f32 0.03125, %v1288_v16 }
 0xcec   :  { %v1291_v18 = vpop.xlane.xlu1 %1290 }
 0xced   :  { %v1294_v19 = vadd.f32 1e-12, %v1292_v17  ;;  %v1293_v20 = vmul.f32 0.03125, %v1291_v18 }
 0xcef   :  { %3239 = vrsqrt.f32 %v1294_v19  ;;  %v1295_v21 = vadd.f32 1e-12, %v1293_v20 }
 0xcf1   :  { %3241 = vrsqrt.f32 %v1295_v21 }
 0xcf9   :  { %v3240_v22 = vpop.eup %3239 }
 0xcfa   :  { %v1298_v24 = vmul.f32 %v3240_v22, %v1282_v7 }
 0xcfb   :  { %v3242_v25 = vpop.eup %3241 }
 0xcfc   :  { %v1304_v26 = vmul.f32 %v2721_v23, %v1298_v24  ;;  %v1299_v28 = vmul.f32 %v3242_v25, %v1283_v9 }
 0xcfe   :  { %v1305_v31 = vmul.f32 %v2721_v23, %v1299_v28  ;;  %v3614_v32 = vadd.f32 %v2722_v30, %v1304_v26 }
 0xd00   :  { %v3616_v33 = vadd.f32 %v2722_v30, %v1305_v31 }
 0xd02   :  { %v1312_v27 = vpack.c.bf16 %v3616_v33, %v3614_v32 }
 0xd04   :  { %2998 = vmatmul.mubr.msk.bf16.vlgmr.msra.gmra.mrb[12].mxu0 %vm169_vm2, %v1312_v27 }
 0xd05   :  { %3003 = vmatprep.mubr.msk.f32.mxu0 %vm3356_vm3, %v3355_v53 }
 0xdd7   :  { %v1373_v36 = vpop.f32.mrb[12].mxu0 }
 0xdd8   :  { %v3626_v37 = vadd.f32 %v2724_v35, %v1373_v36  ;;  %v2999_v38 = vpop.f32.mrb[13].mxu0 }
 0xdd9   :  { %v1376_v39 = vpop.f32.mrb[14].mxu0 }
 0xdda   :  { %v1377_v40 = vadd.f32 %v2724_v35, %v1376_v39  ;;  %1382 = vrot.lane.b32.xlu0 %v3626_v37, %s3357_s28  ;;  %v3000_v41 = vpop.f32.mrb[15].mxu0  ;;  %v3199_v39 = vld [vmem:[#allocation2 + $0x60] sm:$0xff]  }
 0xddc   :  { %1384 = vrot.lane.b32.xlu1 %v1377_v40, %s3357_s28 }
 0xdde   :  { %1462 = vrot.lane.b32.xlu0 %v1377_v40, %s3358_s29 }
 0xde0   :  { %1386 = vrot.lane.b32.xlu1 %v3626_v37, %s3358_s29 }
 0xe4c   :  { %v3634_v42 = vpop.permute.xlu0 %1382 }
 0xe4d   :  { %1538 = vrot.lane.b32.xlu1 %v3634_v42, %s3358_s29 }
 0xe4e   :  { %v3638_v43 = vpop.permute.xlu1 %1384 }
 0xe4f   :  { %1614 = vrot.lane.b32.xlu0 %v3638_v43, %s3358_s29 }
 0xe50   :  { %v1463_v45 = vpop.permute.xlu0 %1462 }
 0xe52   :  { %v1387_v44 = vpop.permute.xlu1 %1386 }
 0xe53   :  { %3002 = vmatpush3.xpose.msk.msra.mxu0 %vm301_vm4, %v1387_v44 }
 0xe54   :  { %3006 = vmatprep.subr.mxu0 %v3355_v53 }
 0xe56   :  { %3004 = vmatmul.mubr.msk.f32.vlgmr.msra.gmra.mrb[6].mxu0 %vm301_vm4, %v3626_v37 }
 0xe57   :  { %3007 = vmatpush3.xpose.msk.msra.mxu0 %vm301_vm4, %v1463_v45  ;;  %3008 = vmatprep.mubr.msk.f32.mxu0 %vm3356_vm3, %v3355_v53 }
 0xe58   :  { %3011 = vmatprep.subr.mxu0 %v3355_v53 }
 0xe5a   :  { %3009 = vmatmul.mubr.msk.f32.vlgmr.msra.gmra.mrb[16].mxu0 %vm301_vm4, %v1377_v40 }
 0xe5b   :  { %3013 = vmatprep.mubr.msk.f32.mxu0 %vm3356_vm3, %v3355_v53 }
 0xebf   :  { %v1539_v46 = vpop.permute.xlu1 %1538 }
 0xec0   :  { %3012 = vmatpush3.xpose.msk.msra.mxu0 %vm301_vm4, %v1539_v46 }
 0xec1   :  { %3016 = vmatprep.subr.mxu0 %v3355_v53  ;;  %v1615_v47 = vpop.permute.xlu0 %1614 }
 0xec3   :  { %3014 = vmatmul.mubr.msk.f32.vlgmr.msra.gmra.mrb[18].mxu0 %vm301_vm4, %v3634_v42 }
 0xec4   :  { %3017 = vmatpush3.xpose.msk.msra.mxu0 %vm301_vm4, %v1615_v47  ;;  %3018 = vmatprep.mubr.msk.f32.mxu0 %vm3356_vm3, %v3355_v53 }
 0xec5   :  { %3021 = vmatprep.subr.mxu0 %v3355_v53 }
 0xec7   :  { %3019 = vmatmul.mubr.msk.f32.vlgmr.msra.gmra.mrb[20].mxu0 %vm301_vm4, %v3638_v43 }
 0xec8   :  { %3023 = vmatprep.mubr.msk.f32.mxu0 %vm3356_vm3, %v3355_v53 }
 0xf29   :  { %v1458_v48 = vpop.f32.mrb[6].mxu0 }
 0xf2a   :  { %v1459_v49 = vadd.f32 %v1458_v48, %v3508_v29  ;;  %v3005_v50 = vpop.f32.mrb[7].mxu0 }
 0xf2c   :  { %v1690_v51 = vsel %vm604_vm5, %v1459_v49, -inf }
 0xf2d   :  { %1691 = vmax.xlane.f32.xlu1 %v1690_v51  ;;  %v1534_v52 = vpop.f32.mrb[16].mxu0 }
 0xf2e   :  { %v1535_v54 = vadd.f32 %v1534_v52, %v3511_v34  ;;  %v3010_v55 = vpop.f32.mrb[17].mxu0 }
 0xf30   :  { %v1693_v56 = vsel %vm604_vm5, %v1535_v54, -inf }
 0xf31   :  { %1694 = vmax.xlane.f32.xlu0 %v1693_v56 }
 0xf96   :  { %v1610_v57 = vpop.f32.mrb[18].mxu0 }
 0xf97   :  { %v1611_v58 = vadd.f32 %v1610_v57, %v3508_v29  ;;  %v3015_v59 = vpop.f32.mrb[19].mxu0 }
 0xf98   :  { %v2741_v59 = vld [vmem:[%s3784_s3 + $0x9] ss:$0 sm:$0xff] }
 0xf99   :  { %v1696_v60 = vsel %vm604_vm5, %v1611_v58, -inf }
 0xf9a   :  { %1697 = vmax.xlane.f32.xlu0 %v1696_v60  ;;  %v1686_v61 = vpop.f32.mrb[20].mxu0 }
 0xf9b   :  { %v1687_v62 = vadd.f32 %v1686_v61, %v3511_v34  ;;  %v3020_v63 = vpop.f32.mrb[21].mxu0 }
 0xf9d   :  { %v1699_v5 = vsel %vm604_vm5, %v1687_v62, -inf }
 0xf9e   :  { %1700 = vmax.xlane.f32.xlu1 %v1699_v5 }
 0xfaf   :  { %1810 = vrot.lane.b32.xlu1 %v1377_v40, %s3348_s7  ;;  %v3200_v40 = vld [vmem:[#allocation2 + $0x68] sm:$0xff]  }
 0xfba   :  { %v1692_v0 = vpop.xlane.xlu1 %1691 }
 0xfbb   :  { %v1702_v6 = vsub.f32 %v1459_v49, %v1692_v0 }
 0xfbd   :  { %v1706_v1 = vmul.f32 1.442695, %v1702_v6 }
 0xfbe   :  { %v1695_v2 = vpop.xlane.xlu0 %1694 }
 0xfbf   :  { %3243 = vpow2.f32 %v1706_v1  ;;  %v1703_v3 = vsub.f32 %v1535_v54, %v1695_v2 }
 0xfc1   :  { %v1708_v29 = vmul.f32 1.442695, %v1703_v3 }
 0xfc3   :  { %3245 = vpow2.f32 %v1708_v29 }
 0xfc9   :  { %v3244_v4 = vpop.eup %3243 }
 0xfca   :  { %v1714_v7 = vsel %vm604_vm5, %v3244_v4, 0.0 }
 0xfcb   :  { %1715 = vadd.xlane.f32.xlu0 %v1714_v7 }
 0xfcd   :  { %v3246_v8 = vpop.eup %3245 }
 0xfce   :  { %v1717_v34 = vsel %vm604_vm5, %v3246_v8, 0.0 }
 0xfd3   :  { %1718 = vadd.xlane.f32.xlu1 %v1717_v34 }
 0xfe1   :  { %1734 = vrot.lane.b32.xlu0 %v3626_v37, %s3348_s7 }
0x1027   :  { %v1698_v9 = vpop.xlane.xlu0 %1697 }
0x1028   :  { %v1704_v10 = vsub.f32 %v1611_v58, %v1698_v9 }
0x102a   :  { %v1710_v11 = vmul.f32 1.442695, %v1704_v10 }
0x102b   :  { %v1701_v12 = vpop.xlane.xlu1 %1700 }
0x102c   :  { %3247 = vpow2.f32 %v1710_v11  ;;  %v1705_v13 = vsub.f32 %v1687_v62, %v1701_v12 }
0x102e   :  { %v1712_v15 = vmul.f32 1.442695, %v1705_v13  ;;  %v3201_v13 = vld [vmem:[#allocation2 + $0x70] sm:$0xff]  }
0x102f   :  { %v1811_v20 = vpop.permute.xlu1 %1810 }
0x1030   :  { %3249 = vpow2.f32 %v1712_v15 }
0x1036   :  { %v3248_v14 = vpop.eup %3247 }
0x1037   :  { %v1720_v16 = vsel %vm604_vm5, %v3248_v14, 0.0 }
0x1038   :  { %1721 = vadd.xlane.f32.xlu0 %v1720_v16 }
0x103a   :  { %v3250_v17 = vpop.eup %3249 }
0x103b   :  { %v1723_v18 = vsel %vm604_vm5, %v3250_v17, 0.0 }
0x103c   :  { %1724 = vadd.xlane.f32.xlu1 %v1723_v18 }
0x104d   :  { %1886 = vrot.lane.b32.xlu1 %v3634_v42, %s3348_s7 }
0x104e   :  { %1962 = vrot.lane.b32.xlu0 %v3638_v43, %s3348_s7 }
0x1051   :  { %2068 = vrot.lane.b32.xlu1 %v3199_v39, %s3359_s1  ;;  %v3207_v39 = vld [vmem:[#allocation2 + $0xa0] sm:$0xff]  }
0x1055   :  { %2070 = vrot.lane.b32.xlu1 %v3200_v40, %s3359_s1  ;;  %v3208_v40 = vld [vmem:[#allocation2 + $0xa8] sm:$0xff]  }
0x1058   :  { %v1716_v19 = vpop.xlane.xlu0 %1715 }
0x1059   :  { %3251 = vrcp.f32 %v1716_v19 }
0x105c   :  { %v1735_v21 = vpop.permute.xlu0 %1734 }
0x105d   :  { %3022 = vmatpush3.msra.mxu0 %v1735_v21 }
0x105e   :  { %3026 = vmatprep.subr.mxu0 %v3355_v53 }
0x1060   :  { %v1719_v22 = vpop.xlane.xlu1 %1718 }
0x1061   :  { %3253 = vrcp.f32 %v1719_v22  ;;  %v2747_v22 = vld [vmem:[%s3784_s3 + $0xa] ss:$0 sm:$0xff] }
0x1063   :  { %v3252_v23 = vpop.eup %3251 }
0x1064   :  { %v1727_v24 = vmul.f32 %v3252_v23, %v3244_v4 }
0x1066   :  { %3024 = vmatmul.mubr.msk.f32.vlgmr.msra.gmra.mrb[22].mxu0 %vm604_vm5, %v1727_v24 }
0x1067   :  { %3027 = vmatpush3.msra.mxu0 %v1811_v20  ;;  %3028 = vmatprep.mubr.msk.f32.mxu0 %vm3356_vm3, %v3355_v53 }
0x1068   :  { %3031 = vmatprep.subr.mxu0 %v3355_v53 }
0x106b   :  { %v3254_v25 = vpop.eup %3253 }
0x106c   :  { %v1729_v26 = vmul.f32 %v3254_v25, %v3246_v8 }
0x106e   :  { %3029 = vmatmul.mubr.msk.f32.vlgmr.msra.gmra.mrb[24].mxu0 %vm604_vm5, %v1729_v26  ;;  %v2748_v26 = vld [vmem:[%s3784_s3 + $0xb] ss:$0 sm:$0xff] }
0x106f   :  { %3033 = vmatprep.mubr.msk.f32.mxu0 %vm3356_vm3, %v3355_v53 }
0x10c5   :  { %v1722_v28 = vpop.xlane.xlu0 %1721 }
0x10c6   :  { %3255 = vrcp.f32 %v1722_v28 }
0x10c9   :  { %v1725_v30 = vpop.xlane.xlu1 %1724  ;;  %v1963_v36 = vpop.permute.xlu0 %1962 }
0x10ca   :  { %3257 = vrcp.f32 %v1725_v30 }
0x10cd   :  { %v1887_v31 = vpop.permute.xlu1 %1886 }
0x10ce   :  { %3032 = vmatpush3.msra.mxu0 %v1887_v31 }
0x10cf   :  { %3036 = vmatprep.subr.mxu0 %v3355_v53 }
0x10d0   :  { %v3256_v27 = vpop.eup %3255 }
0x10d1   :  { %v1731_v35 = vmul.f32 %v3256_v27, %v3248_v14  ;;  %v2069_v45 = vpop.permute.xlu1 %2068 }
0x10d2   :  { %3042 = vmatpush3.bf16.msra.mxu1 %v2069_v45 }
0x10d3   :  { %3034 = vmatmul.mubr.msk.f32.vlgmr.msra.gmra.mrb[26].mxu0 %vm604_vm5, %v1731_v35  ;;  %3043 = vmatprep.subr.bf16.mxu1 %v3355_v53  ;;  %v3203_v35 = vld [vmem:[#allocation2 + $0x80] sm:$0xff]  }
0x10d4   :  { %v3258_v37 = vpop.eup %3257  ;;  %3037 = vmatpush3.msra.mxu0 %v1963_v36  ;;  %3038 = vmatprep.mubr.msk.f32.mxu0 %vm3356_vm3, %v3355_v53  ;;  %v3204_v36 = vld [vmem:[#allocation2 + $0x88] sm:$0xff]  }
0x10d5   :  { %v1733_v38 = vmul.f32 %v3258_v37, %v3250_v17  ;;  %3049 = vmatprep.subr.bf16.mxu0 %v3355_v53  ;;  %v2071_v46 = vpop.permute.xlu1 %2070  ;;  %v3205_v37 = vld [vmem:[#allocation2 + $0x90] sm:$0xff]  }
0x10d6   :  { %3044 = vmatpush3.bf16.msra.mxu1 %v2071_v46 }
0x10d7   :  { %3039 = vmatmul.mubr.msk.f32.vlgmr.msra.gmra.mrb[28].mxu0 %vm604_vm5, %v1733_v38  ;;  %3057 = vmatprep.subr.bf16.mxu1 %v3355_v53  ;;  %v3206_v38 = vld [vmem:[#allocation2 + $0x98] sm:$0xff]  }
0x10d8   :  { %3053 = vmatprep.mubr.msk.bf16.mxu0 %vm3356_vm3, %v3355_v53  ;;  %3050 = vmatpush3.bf16.msra.mxu0 %v3201_v13 }
0x10d9   :  { %3051 = vmatprep.subr.bf16.mxu0 %v3355_v53 }
0x1139   :  { %v1806_v41 = vpop.f32.mrb[22].mxu0 }
0x113a   :  { %v3025_v42 = vpop.f32.mrb[23].mxu0 }
0x113b   :  { %v3210_v42 = vld [vmem:[#allocation2 + $0xb8] sm:$0xff]  }
0x1141   :  { %v1882_v43 = vpop.f32.mrb[24].mxu0 }
0x1142   :  { %v3030_v44 = vpop.f32.mrb[25].mxu0 }
0x11a6   :  { %v1958_v47 = vpop.f32.mrb[26].mxu0 }
0x11a7   :  { %v3035_v48 = vpop.f32.mrb[27].mxu0 }
0x11aa   :  { %v2034_v49 = vpop.f32.mrb[28].mxu0 }
0x11ab   :  { %v3178_v50 = vpack.i.bf16 %v2034_v49, %v1958_v47  ;;  %v3040_v51 = vpop.f32.mrb[29].mxu0 }
0x11ad   :  { %3179 = vrot.lane.b32.xlu0 %v3178_v50, %s3360_s11 }
0x121f   :  { %v3180_v52 = vpop.permute.xlu0 %3179 }
0x1220   :  { %v3182_v54 = vunpack.i.h.bf16 %v3180_v52  ;;  %v3181_v55 = vunpack.i.l.bf16 %v3180_v52 }
0x1222   :  { %v2047_v56 = vsel %vm301_vm4, %v1882_v43, %v3182_v54  ;;  %v2046_v57 = vsel %vm301_vm4, %v1806_v41, %v3181_v55  ;;  %v3209_v41 = vld [vmem:[#allocation2 + $0xb0] sm:$0xff]   ;;  %v2750_v43 = vld [vmem:[%s3784_s3 + $0xc] ss:$0 sm:$0xff] }
0x1223   :  { %v2048_v58 = vpack.c.bf16 %v2047_v56, %v2046_v57 }
0x1225   :  { %3046 = vmatmul.mubr.msk.bf16.vlgmr.msra.gmra.mrb[24].mxu1 %vm169_vm2, %v2048_v58 }
0x1226   :  { %3073 = vmatprep.mubr.msk.bf16.mxu1 %vm3356_vm3, %v3355_v53  ;;  %3058 = vmatpush3.bf16.msra.mxu1 %v3203_v35 }
0x1227   :  { %3059 = vmatprep.subr.bf16.mxu1 %v3355_v53 }
0x122a   :  { %3060 = vmatpush3.bf16.msra.mxu1 %v3204_v36 }
0x122b   :  { %3061 = vmatprep.subr.bf16.mxu1 %v3355_v53 }
0x122e   :  { %3062 = vmatpush3.bf16.msra.mxu1 %v3205_v37 }
0x122f   :  { %3063 = vmatprep.subr.bf16.mxu1 %v3355_v53 }
0x1232   :  { %3064 = vmatpush3.bf16.msra.mxu1 %v3206_v38 }
0x1233   :  { %3065 = vmatprep.subr.bf16.mxu1 %v3355_v53 }
0x1236   :  { %3066 = vmatpush3.bf16.msra.mxu1 %v3207_v39 }
0x1237   :  { %3067 = vmatprep.subr.bf16.mxu1 %v3355_v53 }
0x123a   :  { %3068 = vmatpush3.bf16.msra.mxu1 %v3208_v40 }
0x123b   :  { %3069 = vmatprep.subr.bf16.mxu1 %v3355_v53 }
0x123e   :  { %3070 = vmatpush3.bf16.msra.mxu1 %v3209_v41 }
0x123f   :  { %3071 = vmatprep.subr.bf16.mxu1 %v3355_v53 }
0x1242   :  { %3072 = vmatpush3.bf16.msra.mxu1 %v3210_v42 }
0x12f8   :  { %v2111_v60 = vpop.f32.mrb[24].mxu1 }
0x12f9   :  { %v2112_v61 = vadd.f32 %v2741_v59, %v2111_v60  ;;  %v3047_v62 = vpop.f32.mrb[25].mxu1 }
0x12fa   :  { %v2114_v63 = vpop.f32.mrb[26].mxu1 }
0x12fb   :  { %v2115_v5 = vadd.f32 %v2741_v59, %v2114_v63  ;;  %v3048_v0 = vpop.f32.mrb[27].mxu1  ;;  %v2118_v6 = vadd.f32 %v2112_v61, %v3614_v32 }
0x12fd   :  { %v2122_v1 = vsel %vm169_vm2, %v2118_v6, 0.0  ;;  %v2119_v2 = vadd.f32 %v2115_v5, %v3616_v33  ;;  %v3202_v33 = vld [vmem:[#allocation2 + $0x78] sm:$0xff]  }
0x12fe   :  { %2123 = vadd.xlane.f32.xlu0 %v2122_v1  ;;  %3052 = vmatpush3.bf16.msra.mxu0 %v3202_v33 }
0x12ff   :  { %v2125_v3 = vsel %vm169_vm2, %v2119_v2, 0.0 }
0x1300   :  { %2126 = vadd.xlane.f32.xlu1 %v2125_v3 }
0x138b   :  { %v2124_v29 = vpop.xlane.xlu0 %2123 }
0x138c   :  { %v2128_v4 = vmul.f32 0.03125, %v2124_v29  ;;  %v2755_v29 = vld [vmem:[%s3784_s3 + $0xd] ss:$0 sm:$0xff] }
0x138d   :  { %v2127_v7 = vpop.xlane.xlu1 %2126 }
0x138e   :  { %v2130_v8 = vsub.f32 %v2118_v6, %v2128_v4  ;;  %v2129_v34 = vmul.f32 0.03125, %v2127_v7 }
0x1390   :  { %v2131_v9 = vsub.f32 %v2119_v2, %v2129_v34  ;;  %v2132_v10 = vmul.f32 %v2130_v8, %v2130_v8 }
0x1392   :  { %v2134_v11 = vsel %vm169_vm2, %v2132_v10, 0.0  ;;  %v2133_v12 = vmul.f32 %v2131_v9, %v2131_v9 }
0x1393   :  { %2135 = vadd.xlane.f32.xlu0 %v2134_v11 }
0x1394   :  { %v2137_v32 = vsel %vm169_vm2, %v2133_v12, 0.0 }
0x1397   :  { %2138 = vadd.xlane.f32.xlu0 %v2137_v32 }
0x1420   :  { %v2136_v15 = vpop.xlane.xlu0 %2135 }
0x1421   :  { %v2140_v14 = vmul.f32 0.03125, %v2136_v15 }
0x1423   :  { %v2142_v16 = vadd.f32 1e-12, %v2140_v14 }
0x1424   :  { %v2139_v17 = vpop.xlane.xlu0 %2138 }
0x1425   :  { %3259 = vrsqrt.f32 %v2142_v16  ;;  %v2141_v18 = vmul.f32 0.03125, %v2139_v17 }
0x1427   :  { %v2143_v19 = vadd.f32 1e-12, %v2141_v18 }
0x1429   :  { %3261 = vrsqrt.f32 %v2143_v19 }
0x142f   :  { %v3260_v20 = vpop.eup %3259 }
0x1430   :  { %v2146_v21 = vmul.f32 %v3260_v20, %v2130_v8 }
0x1432   :  { %v2152_v24 = vmul.f32 %v2747_v22, %v2146_v21 }
0x1433   :  { %v3262_v23 = vpop.eup %3261 }
0x1434   :  { %v2147_v25 = vmul.f32 %v3262_v23, %v2131_v9  ;;  %v3726_v30 = vadd.f32 %v2748_v26, %v2152_v24  ;;  %v2402_v23 = vld [vmem:[#allocation5 + $0x98] sm:$0xff]  ;;  %v2403_v24 = vld [vmem:[#allocation5 + $0xa0] sm:$0xff] }
0x1436   :  { %v2153_v28 = vmul.f32 %v2747_v22, %v2147_v25  ;;  %v2404_v25 = vld [vmem:[#allocation5 + $0xa8] sm:$0xff] }
0x1438   :  { %v3728_v31 = vadd.f32 %v2748_v26, %v2153_v28  ;;  %v3361_v26 = vmov 0.0|0.0   ;;  %v3139_v28 = vpack.c.bf16 %v2403_v24, %v2402_v23 }
0x1439   :  { %3138 = vmatprep.subr.bf16.mxu0 %v3361_v26 }
0x143a   :  { %v2160_v27 = vpack.c.bf16 %v3728_v31, %v3726_v30 }
0x143c   :  { %3054 = vmatmul.mubr.msk.bf16.vlgmr.msra.gmra.mrb[32].mxu0 %vm169_vm2, %v2160_v27 }
0x143d   :  { %3085 = vmatprep.mubr.msk.f32.mxu0 %vm3356_vm3, %v3355_v53  ;;  %3140 = vmatpush3.bf16.msra.mxu0 %v3139_v28 }
0x143e   :  { %3141 = vmatprep.subr.bf16.mxu0 %v3361_v26 }
0x150f   :  { %v2219_v44 = vpop.f32.mrb[32].mxu0 }
0x1510   :  { %v2220_v45 = vadd.f32 %v2750_v43, %v2219_v44  ;;  %v3055_v46 = vpop.f32.mrb[33].mxu0 }
0x1511   :  { %v2222_v47 = vpop.f32.mrb[34].mxu0 }
0x1512   :  { %v2228_v48 = vmul.f32 0.044715, %v2220_v45  ;;  %v2223_v49 = vadd.f32 %v2750_v43, %v2222_v47  ;;  %v3056_v50 = vpop.f32.mrb[35].mxu0  ;;  %v2226_v5 = vmul.f32 0.5, %v2220_v45  ;;  %v2766_v43 = vld [vmem:[%s3784_s3 + $0xe] ss:$0 sm:$0xff] }
0x1513   :  { %v2767_v47 = vld [vmem:[%s3784_s3 + $0xf] ss:$0 sm:$0xff]  ;;  %s3363_s3 = smov 125  }
0x1514   :  { %v2230_v51 = vmul.f32 %v2228_v48, %v2220_v45  ;;  %v2229_v52 = vmul.f32 0.044715, %v2223_v49  ;;  %v2227_v0 = vmul.f32 0.5, %v2223_v49 }
0x1516   :  { %v2232_v54 = vmul.f32 %v2230_v51, %v2220_v45  ;;  %v2231_v55 = vmul.f32 %v2229_v52, %v2223_v49  ;;  %v2485_v52 = vld [vmem:[#allocation5 + $0xc0] sm:$0xff] }
0x1518   :  { %v2234_v56 = vadd.f32 %v2232_v54, %v2220_v45  ;;  %v2233_v57 = vmul.f32 %v2231_v55, %v2223_v49  ;;  %v2486_v54 = vld [vmem:[#allocation5 + $0xc8] sm:$0xff]  ;;  %v2487_v55 = vld [vmem:[#allocation5 + $0xd0] sm:$0xff] }
0x151a   :  { %v2236_v58 = vmul.f32 0.7978846, %v2234_v56  ;;  %v2235_v59 = vadd.f32 %v2233_v57, %v2223_v49  ;;  %v3145_v56 = vpack.c.bf16 %v2486_v54, %v2485_v52  ;;  %v2488_v57 = vld [vmem:[#allocation5 + $0xd8] sm:$0xff] }
0x151c   :  { %3263 = vtanh.f32 %v2236_v58  ;;  %v2237_v60 = vmul.f32 0.7978846, %v2235_v59  ;;  %v3148_v58 = vpack.c.bf16 %v2488_v57, %v2487_v55  ;;  %v2768_v59 = vld [vmem:[#allocation5 + $0xb8] ss:$0 sm:$0xff] }
0x151e   :  { %3265 = vtanh.f32 %v2237_v60 }
0x1526   :  { %v3264_v61 = vpop.eup %3263 }
0x1527   :  { %v2240_v62 = vadd.f32 1.0, %v3264_v61 }
0x1528   :  { %v3266_v63 = vpop.eup %3265 }
0x1529   :  { %v2241_v6 = vadd.f32 1.0, %v3266_v63  ;;  %v2242_v1 = vmul.f32 %v2240_v62, %v2226_v5  ;;  %v2568_v5 = vld [vmem:[#allocation5 + $0xe8] sm:$0xff] }
0x152b   :  { %v2243_v2 = vmul.f32 %v2241_v6, %v2227_v0  ;;  %v2569_v0 = vld [vmem:[#allocation5 + $0xf0] sm:$0xf] }
0x152c   :  { %v3151_v6 = vpack.c.bf16 %v2569_v0, %v2568_v5 }
0x152d   :  { %v2244_v3 = vpack.c.bf16 %v2243_v2, %v2242_v1  ;;  %v2770_v1 = vld [vmem:[#allocation5 + $0xe0] ss:$0 sm:$0xff] }
0x152f   :  { %3074 = vmatmul.mubr.bf16.vlgmr.msra.gmra.mrb[28].mxu1 %v2244_v3 }
0x1602   :  { %v2348_v4 = vpop.f32.mrb[28].mxu1 }
0x1603   :  { %v2349_v7 = vadd.f32 %v2755_v29, %v2348_v4  ;;  %v3075_v8 = vpop.f32.mrb[29].mxu1 }
0x1604   :  { %v2351_v34 = vpop.f32.mrb[30].mxu1 }
0x1605   :  { %v2352_v9 = vadd.f32 %v2755_v29, %v2351_v34  ;;  %v3076_v10 = vpop.f32.mrb[31].mxu1  ;;  %v2355_v11 = vadd.f32 %v2349_v7, %v3726_v30  ;;  %v2405_v30 = vld [vmem:[#allocation5 + $0xb0] sm:$0xff] }
0x1607   :  { %v2359_v12 = vsel %vm169_vm2, %v2355_v11, 0.0  ;;  %v2356_v32 = vadd.f32 %v2352_v9, %v3728_v31  ;;  %v3142_v31 = vpack.c.bf16 %v2405_v30, %v2404_v25 }
0x1608   :  { %2360 = vadd.xlane.f32.xlu0 %v2359_v12 }
0x1609   :  { %v2362_v13 = vsel %vm169_vm2, %v2356_v32, 0.0  ;;  %3143 = vmatpush3.bf16.msra.mxu0 %v3142_v31 }
0x160a   :  { %2363 = vadd.xlane.f32.xlu1 %v2362_v13  ;;  %3144 = vmatprep.subr.bf16.mxu0 %v3361_v26 }
0x1695   :  { %v2361_v33 = vpop.xlane.xlu0 %2360 }
0x1696   :  { %v2365_v15 = vmul.f32 0.03125, %v2361_v33 }
0x1697   :  { %v2364_v14 = vpop.xlane.xlu1 %2363 }
0x1698   :  { %v2367_v16 = vsub.f32 %v2355_v11, %v2365_v15  ;;  %v2366_v17 = vmul.f32 0.03125, %v2364_v14 }
0x169a   :  { %v2368_v18 = vsub.f32 %v2356_v32, %v2366_v17  ;;  %v2369_v19 = vmul.f32 %v2367_v16, %v2367_v16 }
0x169c   :  { %v2371_v20 = vsel %vm169_vm2, %v2369_v19, 0.0  ;;  %v2370_v21 = vmul.f32 %v2368_v18, %v2368_v18 }
0x169d   :  { %2372 = vadd.xlane.f32.xlu0 %v2371_v20 }
0x169e   :  { %v2374_v22 = vsel %vm169_vm2, %v2370_v21, 0.0 }
0x169f   :  { %2375 = vadd.xlane.f32.xlu1 %v2374_v22 }
0x172a   :  { %v2373_v27 = vpop.xlane.xlu0 %2372 }
0x172b   :  { %v2377_v35 = vmul.f32 0.03125, %v2373_v27 }
0x172c   :  { %v2376_v36 = vpop.xlane.xlu1 %2375 }
0x172d   :  { %v2379_v37 = vadd.f32 1e-12, %v2377_v35  ;;  %v2378_v38 = vmul.f32 0.03125, %v2376_v36 }
0x172f   :  { %3267 = vrsqrt.f32 %v2379_v37  ;;  %v2380_v39 = vadd.f32 1e-12, %v2378_v38 }
0x1731   :  { %3269 = vrsqrt.f32 %v2380_v39 }
0x1739   :  { %v3268_v40 = vpop.eup %3267 }
0x173a   :  { %v2383_v41 = vmul.f32 %v3268_v40, %v2367_v16 }
0x173b   :  { %v3270_v42 = vpop.eup %3269 }
0x173c   :  { %v2384_v44 = vmul.f32 %v3270_v42, %v2368_v18  ;;  %v2389_v45 = vmul.f32 %v2766_v43, %v2383_v41 }
0x173e   :  { %v2390_v46 = vmul.f32 %v2766_v43, %v2384_v44  ;;  %v2395_v49 = vadd.f32 %v2767_v47, %v2389_v45 }
0x1740   :  { %v2396_v48 = vadd.f32 %v2767_v47, %v2390_v46 }
0x1742   :  { %v2398_v50 = vrot.slane %v2396_v48, 7 }
0x1744   :  { %v2401_v51 = vsel %vm2400_vm6, %v2395_v49, %v2398_v50 }
0x1745   :  { %3086 = vmatmul.mubr.msk.f32.vlgmr.msra.gmra.mrb[30].mxu0 %vm169_vm2, %v2401_v51 }
0x1746   :  { %3096 = vmatprep.mubr.msk.f32.mxu0 %vm3356_vm3, %v3355_v53  ;;  %3146 = vmatpush3.bf16.msra.mxu0 %v3145_v56 }
0x1747   :  { %3147 = vmatprep.subr.bf16.mxu0 %v3361_v26 }
0x174a   :  { %3149 = vmatpush3.bf16.msra.mxu0 %v3148_v58 }
0x174b   :  { %3150 = vmatprep.subr.bf16.mxu0 %v3361_v26 }
0x1818   :  { %v2480_v60 = vpop.f32.mrb[30].mxu0 }
0x1819   :  { %v2481_v61 = vadd.f32 %v2768_v59, %v2480_v60  ;;  %v3087_v62 = vpop.f32.mrb[31].mxu0 }
0x181b   :  { %3271 = vtanh.f32 %v2481_v61 }
0x1825   :  { %v3272_v63 = vpop.eup %3271 }
0x1826   :  { %3097 = vmatmul.mubr.msk.f32.vlgmr.msra.gmra.mrb[36].mxu0 %vm169_vm2, %v3272_v63 }
0x1827   :  { %3103 = vmatprep.mubr.msk.f32.mxu0 %vm3356_vm3, %v3355_v53  ;;  %3153 = vmatpush3.bf16.msk.msra.mxu0 %vm3152_vm9, %v3151_v6 }
0x18f9   :  { %v2563_v2 = vpop.f32.mrb[36].mxu0 }
0x18fa   :  { %v2564_v3 = vadd.f32 %v2770_v1, %v2563_v2  ;;  %v3098_v29 = vpop.f32.mrb[37].mxu0 }
0x18fc   :  { %3273 = vtanh.f32 %v2564_v3  ;;  %2656 = vst.msk [vmem:[#allocation7] sm:$0x3] %vm2655_vm10, %v2564_v3 }
0x1906   :  { %v3274_v4 = vpop.eup %3273 }
0x1907   :  { %2576 = vrot.lane.b32.xlu1 %v3274_v4, %s3363_s3 }
0x1979   :  { %v2577_v7 = vpop.permute.xlu1 %2576 }
0x197a   :  { %3104 = vmatmul.mubr.msk.f32.vlgmr.msra.gmra.mrb[38].mxu0 %vm2578_vm11, %v2577_v7 }
0x197b   :  { %3330 = shalt.err (!%p3327_p6)
}
0x197c   :  { %s3331_s19 = scalar_lea.hbm %s3786_s5, 32 }
0x197d   :  { %p3332_p7 = scmp.ne.s32.totalorder %s3786_s5, %s3331_s19  ;;  %p3335_p8 = scmp.lt.u32.totalorder %s3331_s19, %s3786_s5 }
0x197f   :  { %p3337_p9 = pnand %p3335_p8, %p3332_p7 }
0x1981   :  { %3340 = shalt.err (!%p3337_p9)
}
0x1982   :  { %2668 = dma.vmem_to_hbm [thread:$0]  %s2666_s15, 32, %s3786_s5, [#allocation4]   ;;  %v2772_v53 = vld [vmem:[#allocation5 + $0xf4] ss:$0 sm:$0xff]  ;;  %vm2657_vm12 = vcmask 91136  }
0x1a4d   :  { %v2651_v8 = vpop.f32.mrb[38].mxu0 }
0x1a4e   :  { %v2652_v34 = vadd.f32 %v2772_v53, %v2651_v8  ;;  %v3105_v9 = vpop.f32.mrb[39].mxu0 }
0x1a50   :  { %2658 = vst.msk [vmem:[%s3787_s6] sm:$0x3] %vm2657_vm12, %v2652_v34 }
0x1a51   :  { %3345 = dma.done.wait [#allocation4], 32  }
0x1a52   :  { %3346 = vsyncadd [#allocation4], 4294967264 }
0x1a53   :  { %2676 = vsyncpa [#allocation3], 1 }
0x1a54   :  { %2677 = vsyncpa [#allocation6], 1 }
0x1a55   :  { %2678 = vsyncpa [#allocation4], 1 }

</bundles_post_ra>
